<compile_context>
chip_gen: v6e
topology: v6e:2x2x1
jax: 0.10.0
libtpu: 0.0.40
codegen_flags: <defaults>
</compile_context>

<pallas_src>
import numpy as np
import jax
import jax.numpy as jnp
from jax.experimental import pallas as pl
from jax.experimental.pallas import tpu as pltpu


# ---------------------------------------------------------------------------
# Kernels
# ---------------------------------------------------------------------------

def _ge_kernel_full(v_ref, bt_ref, w_ref, o_ref):
    """Full-E path. v:(tm,D) bt:(D,E) w:(1,E) o:(tm,2E). E % 128 == 0."""
    E = bt_ref.shape[1]
    vp = jnp.dot(v_ref[...], bt_ref[...], preferred_element_type=jnp.float32)
    w = w_ref[...]                                   # (1, E) broadcasts over rows
    # Two lane-aligned static-slice stores; no concatenate copy in VMEM.
    o_ref[:, :E] = (w * jnp.cos(vp)).astype(o_ref.dtype)
    o_ref[:, E:] = (w * jnp.sin(vp)).astype(o_ref.dtype)


def _ge_kernel_full_concat(v_ref, bt_ref, w_ref, o_ref):
    """Fallback for E % 128 != 0.  The exact (N, 2E) layout is required, so the
    in-kernel concat (one full-width store) beats a padded output + post-slice
    that would re-traverse the whole output in XLA."""
    vp = jnp.dot(v_ref[...], bt_ref[...], preferred_element_type=jnp.float32)
    w = w_ref[...]
    out = jnp.concatenate([w * jnp.cos(vp), w * jnp.sin(vp)], axis=-1)
    o_ref[...] = out.astype(o_ref.dtype)


def _ge_kernel_tiled(v_ref, bt_ref, w_ref, o_ref):
    """E-tiled fallback for very large E only. Grid = (rows, 2, E//te); axis 1
    selects cos vs sin half. v:(tm,D) bt:(D,te) w:(1,te) o:(tm,te)."""
    h = pl.program_id(1)
    vp = jnp.dot(v_ref[...], bt_ref[...], preferred_element_type=jnp.float32)
    w = w_ref[...]

    @pl.when(h == 0)
    def _():
        o_ref[...] = (w * jnp.cos(vp)).astype(o_ref.dtype)

    @pl.when(h != 0)
    def _():
        o_ref[...] = (w * jnp.sin(vp)).astype(o_ref.dtype)


# ---------------------------------------------------------------------------
# Wrapper
# ---------------------------------------------------------------------------

def _round_up(x, m):
    return ((x + m - 1) // m) * m


def _pick_te(E, te_max):
    """Largest multiple of 128 <= te_max that divides E (E % 128 == 0 assumed)."""
    te = max(128, (min(te_max, E) // 128) * 128)
    while te > 128 and E % te != 0:
        te -= 128
    return te


def _vmem_budgets(block_budget, vmem_limit):
    """Generation-gated VMEM knobs.

    v5e/v6e: 128 MiB VMEM/TC -> large double-buffered blocks are fine.
    v7x:     64 MiB VMEM/TC  -> keep the working set ~20 MiB, limit <= 48 MiB.
    """
    if block_budget is not None and vmem_limit is not None:
        return block_budget, vmem_limit
    try:
        cap = pltpu.get_tpu_info().vmem_capacity_bytes
    except Exception:
        cap = 64 * 1024 * 1024                      # conservative (v7x-safe)
    if cap >= 100 * 1024 * 1024:                    # v5e / v6e class
        auto_budget, auto_limit = 48 * 1024 * 1024, 96 * 1024 * 1024
    else:                                           # v7x class
        auto_budget, auto_limit = 20 * 1024 * 1024, 48 * 1024 * 1024
    if block_budget is None:
        block_budget = auto_budget
    if vmem_limit is None:
        vmem_limit = auto_limit
    return block_budget, vmem_limit


def gaussian_encoding_forward(v, B, weight, *,
                              out_dtype=jnp.float32,
                              tm_cap=4096,
                              te_max=512,
                              target_out_bytes_per_step=4 * 1024 * 1024,
                              vmem_block_budget_bytes=None,
                              vmem_limit_bytes=None):
    """v: (N, D) f32, B: (E, D) f32, weight: (E,) f32 -> (N, 2E) out_dtype.

    out_dtype=jnp.bfloat16 is recommended when downstream permits: the kernel
    is HBM-write-bound on v5e/v6e and halving store bytes is ~1.7-2x there.
    Matmul and cos/sin always run in f32; only the final store narrows.
    """
    N, D = v.shape
    E, Db = B.shape
    assert D == Db
    out_itemsize = jnp.dtype(out_dtype).itemsize

    # Done ONCE outside the kernel: transpose B and fold in 2*pi.
    bt = (2.0 * np.pi) * B.T.astype(jnp.float32)          # (D, E)
    w2d = weight.reshape(1, E).astype(jnp.float32)        # (1, E)

    block_budget, vmem_limit = _vmem_budgets(vmem_block_budget_bytes,
                                             vmem_limit_bytes)

    # ---- full-E vs tiled-E: budget-based, tiled only when full can't fit ----
    fixed_full = 2 * (D * E * 4) + 2 * (E * 4)      # double-buffered bt + w
    per_row_full = D * 4 + 2 * E * out_itemsize
    min_tm = 128
    full_fits = fixed_full + 2 * min_tm * per_row_full <= block_budget
    tiled_e = (E % 128 == 0) and not full_fits

    if tiled_e:
        te = _pick_te(E, te_max)
        per_row = D * 4 + te * out_itemsize
        fixed = 2 * (D * te * 4) + 2 * (te * 4)
        out_cols_per_step = te
    else:
        te = E
        per_row = per_row_full
        fixed = fixed_full
        out_cols_per_step = 2 * E

    # ---- row tile: sized from target bytes/step, bounded by N and VMEM ------
    tm_eff = max(min_tm,
                 target_out_bytes_per_step // max(out_cols_per_step * out_itemsize, 1))
    tm_eff = min(tm_eff, tm_cap, _round_up(N, 8))
    # Keep >= 4 row tiles for large N so v7x's two TensorCores both get work.
    if N >= 4 * 256:
        tm_eff = min(tm_eff, max(256, _round_up((N + 3) // 4, 8)))
    tm_eff = max(8, (tm_eff // 8) * 8)
    while tm_eff > 8 and fixed + 2 * tm_eff * per_row > block_budget:
        tm_eff = max(8, (tm_eff // 2 // 8) * 8)

    # Ragged N: exact output shape; Pallas masks the overhanging edge block.
    n_row_tiles = pl.cdiv(N, tm_eff)

    cost = pl.CostEstimate(
        flops=2 * N * E * D,
        transcendentals=2 * N * E,
        bytes_accessed=4 * (N * D + D * E + E) + out_itemsize * N * 2 * E,
    )

    # TODO(synk): optional alpha<1 column skip (weight[k]==0 for k>alpha*E) —
    # worthwhile only when EUP-bound (v7x / bf16 out); zero columns still cost
    # output bandwidth, so it is intentionally not applied here.

    if tiled_e:
        n_te = E // te
        out = pl.pallas_call(
            _ge_kernel_tiled,
            out_shape=jax.ShapeDtypeStruct((N, 2 * E), out_dtype),
            grid_spec=pltpu.PrefetchScalarGridSpec(
                num_scalar_prefetch=0,
                grid=(n_row_tiles, 2, n_te),
                in_specs=[
                    pl.BlockSpec((tm_eff, D), lambda i, h, j: (i, 0)),   # v rows
                    pl.BlockSpec((D, te), lambda i, h, j: (0, j)),       # Bt cols
                    pl.BlockSpec((1, te), lambda i, h, j: (0, j)),       # weights
                ],
                out_specs=pl.BlockSpec((tm_eff, te),
                                       lambda i, h, j: (i, h * n_te + j)),
            ),
            compiler_params=pltpu.CompilerParams(
                dimension_semantics=("parallel", "arbitrary", "parallel"),
                vmem_limit_bytes=vmem_limit,
            ),
            cost_estimate=cost,
        )(v, bt, w2d)
    else:
        kernel = _ge_kernel_full if E % 128 == 0 else _ge_kernel_full_concat
        out = pl.pallas_call(
            kernel,
            out_shape=jax.ShapeDtypeStruct((N, 2 * E), out_dtype),
            grid_spec=pltpu.PrefetchScalarGridSpec(
                num_scalar_prefetch=0,
                grid=(n_row_tiles,),
                in_specs=[
                    pl.BlockSpec((tm_eff, D), lambda i: (i, 0)),   # v row tile
                    pl.BlockSpec((D, E), lambda i: (0, 0)),        # full Bt (resident)
                    pl.BlockSpec((1, E), lambda i: (0, 0)),        # full weights
                ],
                out_specs=pl.BlockSpec((tm_eff, 2 * E), lambda i: (i, 0)),
            ),
            compiler_params=pltpu.CompilerParams(
                dimension_semantics=("parallel",),
                vmem_limit_bytes=vmem_limit,
            ),
            cost_estimate=cost,
        )(v, bt, w2d)

    return out


# ---------------------------------------------------------------------------
# Plain-JAX glue replicating the PyTorch module's setup / weight vector
# ---------------------------------------------------------------------------

def make_gaussian_encoding_params(key, input_size, encoding_size_half, sigma):
    """Replicates __init__: B = sigma*randn, rows sorted by frequency (ascending)."""
    B = sigma * jax.random.normal(key, (encoding_size_half, input_size),
                                  dtype=jnp.float32)
    B_max = jnp.max(jnp.abs(B))                     # kept for parity; unused in fwd
    freq = jnp.sqrt(jnp.sum(B ** 2, axis=1))
    idx = jnp.argsort(freq)
    return B[idx, :], B_max


def make_weight(encoding_size_half, alpha):
    """alpha-dependent soft-masking weights (tiny; computed as glue)."""
    k = jnp.arange(encoding_size_half, dtype=jnp.float32)
    aE = alpha * encoding_size_half
    weight = 0.5 * (1.0 - jnp.cos((aE - k) * np.pi))
    weight = jnp.where(aE < k, 0.0, weight)
    weight = jnp.where(aE - k >= 1.0, 1.0, weight)
    return weight


def gaussian_encoding(v, B, alpha=None, **kw):
    """Mirror of the PyTorch forward(v, alpha)."""
    weight = make_weight(B.shape[0], 1.0 if alpha is None else alpha)
    return gaussian_encoding_forward(v, B, weight, **kw)


# ---------------------------------------------------------------------------
# Self-test
# ---------------------------------------------------------------------------

if __name__ == "__main__":
    key = jax.random.PRNGKey(0)
    kB1, kv1, kB2, kv2, kB3, kv3 = jax.random.split(key, 6)

    def reference(v, B, weight):
        # Same math as the PyTorch forward; 2*pi folded into B.T exactly like
        # the kernel so the comparison isolates the Pallas mechanics.
        bt = (2.0 * np.pi) * B.T
        vp = v @ bt
        return jnp.concatenate([weight * jnp.cos(vp),
                                weight * jnp.sin(vp)], axis=-1)

    sigma = 10.0

    # Case 1: ragged N (N=100) -> exercises cdiv grid + masked edge block,
    # full-E two-slice-store path, f32 output.
    D1, E1, N1, alpha1 = 4, 128, 100, 0.6
    B1, _ = make_gaussian_encoding_params(kB1, D1, E1, sigma)
    v1 = jax.random.normal(kv1, (N1, D1), dtype=jnp.float32)
    w1 = make_weight(E1, alpha1)
    out1 = jax.block_until_ready(gaussian_encoding_forward(v1, B1, w1))
    assert out1.shape == (N1, 2 * E1)
    np.testing.assert_allclose(np.asarray(out1), np.asarray(reference(v1, B1, w1)),
                               rtol=1e-5, atol=2e-5)

    # Case 2: force the E-tiled fallback via a tiny VMEM block budget,
    # with ragged N (N=60) to also exercise edge masking on that path.
    D2, E2, N2, alpha2 = 4, 256, 60, 0.9
    B2, _ = make_gaussian_encoding_params(kB2, D2, E2, sigma)
    v2 = jax.random.normal(kv2, (N2, D2), dtype=jnp.float32)
    w2 = make_weight(E2, alpha2)
    out2 = jax.block_until_ready(
        gaussian_encoding_forward(v2, B2, w2, te_max=128,
                                  vmem_block_budget_bytes=300_000))
    assert out2.shape == (N2, 2 * E2)
    np.testing.assert_allclose(np.asarray(out2), np.asarray(reference(v2, B2, w2)),
                               rtol=1e-5, atol=2e-5)

    # Case 3: bf16 output (recommended HBM-write-bound config), ragged N.
    D3, E3, N3 = 4, 128, 300
    B3, _ = make_gaussian_encoding_params(kB3, D3, E3, sigma)
    v3 = jax.random.normal(kv3, (N3, D3), dtype=jnp.float32)
    out3 = jax.block_until_ready(
        gaussian_encoding(v3, B3, alpha=None, out_dtype=jnp.bfloat16))
    assert out3.shape == (N3, 2 * E3) and out3.dtype == jnp.bfloat16
    w3 = make_weight(E3, 1.0)
    np.testing.assert_allclose(np.asarray(out3).astype(np.float32),
                               np.asarray(reference(v3, B3, w3)),
                               rtol=2e-2, atol=2e-2)

    print("KERNEL_OK")
</pallas_src>

<mosaic_0001>
module attributes {stable_mosaic.version = 11 : i64} {
  func.func @_ge_kernel_full(%arg0: i32, %arg1: memref<104x4xf32, #tpu.memory_space<vmem>>, %arg2: memref<4x128xf32, #tpu.memory_space<vmem>>, %arg3: memref<1x128xf32, #tpu.memory_space<vmem>>, %arg4: memref<104x256xf32, #tpu.memory_space<vmem>>) attributes {dimension_semantics = [#tpu.dimension_semantics<parallel>], iteration_bounds = array<i64: 1>, scalar_prefetch = 0 : i64, scratch_operands = 0 : i64, tpu.core_type = #tpu.core_type<tc>, window_params = [{transform_indices = @transform_0, window_bounds = array<i64: 104, 4>}, {pipeline_mode = #tpu.pipeline_mode<synchronous>, transform_indices = @transform_1, window_bounds = array<i64: 4, 128>}, {pipeline_mode = #tpu.pipeline_mode<synchronous>, transform_indices = @transform_2, window_bounds = array<i64: 1, 128>}, {transform_indices = @transform_3, window_bounds = array<i64: 104, 256>}]} {
    %c0 = arith.constant 0 : index
    %c0_0 = arith.constant 0 : index
    %0 = vector.load %arg1[%c0, %c0_0] : memref<104x4xf32, #tpu.memory_space<vmem>>, vector<104x4xf32>
    %c0_1 = arith.constant 0 : index
    %c0_2 = arith.constant 0 : index
    %1 = vector.load %arg2[%c0_1, %c0_2] : memref<4x128xf32, #tpu.memory_space<vmem>>, vector<4x128xf32>
    %cst = arith.constant dense<0.000000e+00> : vector<104x128xf32>
    %2 = tpu.matmul %0, %1, %cst {dimension_numbers = #tpu.dot_dimension_numbers<[1], [0], [0], [1], [0, 0, 1, 1], [], []>} : vector<104x4xf32>, vector<4x128xf32>, vector<104x128xf32> -> vector<104x128xf32>
    %c0_3 = arith.constant 0 : index
    %c0_4 = arith.constant 0 : index
    %3 = vector.load %arg3[%c0_3, %c0_4] : memref<1x128xf32, #tpu.memory_space<vmem>>, vector<1x128xf32>
    %4 = math.cos %2 : vector<104x128xf32>
    %5 = vector.broadcast %3 : vector<1x128xf32> to vector<104x128xf32>
    %6 = arith.mulf %5, %4 : vector<104x128xf32>
    %c0_5 = arith.constant 0 : index
    %c0_6 = arith.constant 0 : index
    %7 = vector.load %arg4[%c0_5, %c0_6] : memref<104x256xf32, #tpu.memory_space<vmem>>, vector<104x128xf32>
    tpu.vector_store %arg4[%c0_5, %c0_6], %6 {strides = array<i32>} : memref<104x256xf32, #tpu.memory_space<vmem>>, vector<104x128xf32>,
    %8 = math.sin %2 : vector<104x128xf32>
    %9 = vector.broadcast %3 : vector<1x128xf32> to vector<104x128xf32>
    %10 = arith.mulf %9, %8 : vector<104x128xf32>
    %c0_7 = arith.constant 0 : index
    %c128 = arith.constant 128 : index
    %11 = vector.load %arg4[%c0_7, %c128] : memref<104x256xf32, #tpu.memory_space<vmem>>, vector<104x128xf32>
    tpu.vector_store %arg4[%c0_7, %c128], %10 {strides = array<i32>} : memref<104x256xf32, #tpu.memory_space<vmem>>, vector<104x128xf32>,
    return
  }
  func.func @transform_0(%arg0: i32) -> (i32, i32) {
    %c0_i32 = arith.constant 0 : i32
    %c0_i32_0 = arith.constant 0 : i32
    return %arg0, %c0_i32 : i32, i32
  }
  func.func @transform_1(%arg0: i32) -> (i32, i32) {
    %c0_i32 = arith.constant 0 : i32
    %c0_i32_0 = arith.constant 0 : i32
    %c0_i32_1 = arith.constant 0 : i32
    return %c0_i32, %c0_i32_0 : i32, i32
  }
  func.func @transform_2(%arg0: i32) -> (i32, i32) {
    %c0_i32 = arith.constant 0 : i32
    %c0_i32_0 = arith.constant 0 : i32
    %c0_i32_1 = arith.constant 0 : i32
    return %c0_i32, %c0_i32_0 : i32, i32
  }
  func.func @transform_3(%arg0: i32) -> (i32, i32) {
    %c0_i32 = arith.constant 0 : i32
    %c0_i32_0 = arith.constant 0 : i32
    return %arg0, %c0_i32 : i32, i32
  }
}

</mosaic_0001>

<bundles_post_ra>
// kernel: tpu_custom_call.1
= control target key start
LH: loop header
LB: loop body
LE: loop exit
PB: predicated region body
PF: predicated region fallthrough
CT: control target
= control target key end

     0   :  { %vm69_vm0 = vcmask 1043456   ;;  %v3284_v1 = vmov 0.0   ;;  %vm29_vm1 = vcmask 31744   ;;  %vm3285_vm2 = vmmov 0   ;;  %s4542_s0 = inlined_call_operand.vmem [shape: f32[100,4], index: 0, kind: input, shape index: {}]   ;;  %s4543_s1 = inlined_call_operand.vmem [shape: f32[4,128], index: 1, kind: input, shape index: {}]   ;;  %s4544_s2 = inlined_call_operand.vmem [shape: f32[1,128], index: 2, kind: input, shape index: {}]   ;;  %s4545_s3 = inlined_call_operand.hbm [shape: f32[100,256], index: 3, kind: output, shape index: {}]  }
   0x1   :  { %v28_v0 = vld [vmem:[%s4543_s1] sm:$0xf]  ;;  %3102 = vmatprep.subr.mxu0 %v3284_v1  ;;  %3143 = vmatprep.subr.mxu1 %v3284_v1  ;;  %v22_v3 = vld [vmem:[%s4542_s0 + $0x38] sm:$0xff]  ;;  %v16_v4 = vld [vmem:[%s4542_s0 + $0x8] sm:$0xff] }
   0x2   :  { %v15_v2 = vld [vmem:[%s4542_s0] sm:$0xff]  ;;  %3103 = vmatpush3.msk.msra.mxu0 %vm69_vm0, %v28_v0  ;;  %3144 = vmatpush3.msk.msra.mxu1 %vm69_vm0, %v28_v0 }
   0x3   :  { %3104 = vmatprep.mubr.msk.f32.mxu0 %vm3285_vm2, %v3284_v1  ;;  %3125 = vmatprep.mubr.msk.f32.mxu1 %vm3285_vm2, %v3284_v1  ;;  %v23_v5 = vld [vmem:[%s4542_s0 + $0x40] sm:$0xff] }
   0x4   :  { %3105 = vmatmul.mubr.msk.f32.vlgmr.msra.gmra.mxu0 %vm29_vm1, %v15_v2  ;;  %3126 = vmatmul.mubr.msk.f32.vlgmr.msra.gmra.mxu1 %vm29_vm1, %v22_v3 }
   0x5   :  { %3107 = vmatprep.mubr.msk.f32.mxu0 %vm3285_vm2, %v3284_v1  ;;  %3128 = vmatprep.mubr.msk.f32.mxu1 %vm3285_vm2, %v3284_v1 }
   0x6   :  { %8 = vsyncpa [#allocation3], 0  ;;  %v17_v6 = vld [vmem:[%s4542_s0 + $0x10] sm:$0xff]  ;;  %v24_v7 = vld [vmem:[%s4542_s0 + $0x48] sm:$0xff]  ;;  %v3286_v54 = vmov 683565275  }
   0x7   :  { %v18_v8 = vld [vmem:[%s4542_s0 + $0x18] sm:$0xff]  ;;  %v25_v9 = vld [vmem:[%s4542_s0 + $0x50] sm:$0xff]  ;;  %v19_v10 = vld [vmem:[%s4542_s0 + $0x20] sm:$0xff]  ;;  %v3287_v58 = vmov 2475754826  }
   0x8   :  { %3108 = vmatmul.mubr.msk.f32.gmra.mxu0 %vm29_vm1, %v16_v4  ;;  %3129 = vmatmul.mubr.msk.f32.gmra.mxu1 %vm29_vm1, %v23_v5  ;;  %v26_v11 = vld [vmem:[%s4542_s0 + $0x58] sm:$0xff]  ;;  %v20_v12 = vld [vmem:[%s4542_s0 + $0x28] sm:$0xff]  ;;  %v27_v13 = vld [vmem:[%s4542_s0 + $0x60] sm:$0xff]  ;;  %v3288_v60 = vmov 2131351028  }
   0x9   :  { %3110 = vmatprep.mubr.msk.f32.mxu0 %vm3285_vm2, %v3284_v1  ;;  %3131 = vmatprep.mubr.msk.f32.mxu1 %vm3285_vm2, %v3284_v1  ;;  %v21_v14 = vld [vmem:[%s4542_s0 + $0x30] sm:$0xff]  ;;  %v3289_v62 = vmov 2102212464   ;;  %v3290_v0 = vmov 920167782  }
   0xc   :  { %3111 = vmatmul.mubr.msk.f32.gmra.mxu0 %vm29_vm1, %v17_v6  ;;  %3132 = vmatmul.mubr.msk.f32.gmra.mxu1 %vm29_vm1, %v24_v7 }
   0xd   :  { %3113 = vmatprep.mubr.msk.f32.mxu0 %vm3285_vm2, %v3284_v1  ;;  %3134 = vmatprep.mubr.msk.f32.mxu1 %vm3285_vm2, %v3284_v1 }
  0x10   :  { %3114 = vmatmul.mubr.msk.f32.gmra.mxu0 %vm29_vm1, %v18_v8  ;;  %3135 = vmatmul.mubr.msk.f32.gmra.mxu1 %vm29_vm1, %v25_v9  ;;  %v3291_v8 = vmov 1326507024  }
  0x11   :  { %3116 = vmatprep.mubr.msk.f32.mxu0 %vm3285_vm2, %v3284_v1  ;;  %3137 = vmatprep.mubr.msk.f32.mxu1 %vm3285_vm2, %v3284_v1 }
  0x14   :  { %3117 = vmatmul.mubr.msk.f32.gmra.mxu0 %vm29_vm1, %v19_v10  ;;  %3138 = vmatmul.mubr.msk.f32.gmra.mxu1 %vm29_vm1, %v26_v11 }
  0x15   :  { %3119 = vmatprep.mubr.msk.f32.mxu0 %vm3285_vm2, %v3284_v1  ;;  %3140 = vmatprep.mubr.msk.f32.mxu1 %vm3285_vm2, %v3284_v1 }
  0x18   :  { %3120 = vmatmul.mubr.msk.f32.gmra.mxu0 %vm29_vm1, %v20_v12  ;;  %3141 = vmatmul.mubr.msk.f32.gmra.mxu1 %vm29_vm1, %v27_v13 }
  0x19   :  { %3122 = vmatprep.mubr.msk.f32.mxu0 %vm3285_vm2, %v3284_v1 }
  0x1c   :  { %3123 = vmatmul.mubr.msk.f32.gmra.mxu0 %vm29_vm1, %v21_v14 }
  0xc4   :  { %v3383_v15 = vpop.f32.mrf.mxu0  ;;  %v3385_v16 = vpop.f32.mrf.mxu1 }
  0xc5   :  { %v204_v17 = vand.u32 2147483647, %v3383_v15  ;;  %v207_v18 = vand.u32 2139095040, %v3383_v15  ;;  %v925_v19 = vand.u32 2147483647, %v3385_v16  ;;  %v928_v20 = vand.u32 2139095040, %v3385_v16 }
  0xc6   :  { %v3106_v21 = vpop.f32.mrf.mxu0  ;;  %v3127_v22 = vpop.f32.mrf.mxu1  ;;  %vm206_vm0 = vcmp.lt.s32.totalorder %v3383_v15, 0 }
  0xc7   :  { %v208_v23 = vshrl.u32 %v207_v18, 23  ;;  %v211_v24 = vand.u32 8388607, %v204_v17  ;;  %v929_v25 = vshrl.u32 %v928_v20, 23  ;;  %v932_v26 = vand.u32 8388607, %v925_v19 }
  0xc8   :  { %v3395_v27 = vpop.f32.mrf.mxu0  ;;  %v3397_v28 = vpop.f32.mrf.mxu1  ;;  %vm3489_vm1 = vcmp.le.f32.partialorder %v204_v17, 0.7853982 }
  0xc9   :  { %v2983_v29 = vadd.s32 4294967169, %v208_v23  ;;  %v3011_v30 = vadd.s32 4294967169, %v929_v25  ;;  %v310_v31 = vand.u32 2139095040, %v3395_v27  ;;  %v212_v35 = vor.u32 8388608, %v211_v24 }
  0xca   :  { %v3109_v32 = vpop.f32.mrf.mxu0  ;;  %v3130_v33 = vpop.f32.mrf.mxu1  ;;  %v933_v36 = vor.u32 8388608, %v932_v26  ;;  %v307_v51 = vand.u32 2147483647, %v3395_v27 }
  0xcb   :  { %v214_v34 = vadd.s32 1, %v2983_v29  ;;  %v935_v37 = vadd.s32 1, %v3011_v30  ;;  %v311_v38 = vshrl.u32 %v310_v31, 23  ;;  %v3404_v48 = vshll.u32 %v212_v35, 8 }
  0xcc   :  { %v3400_v39 = vpop.f32.mrf.mxu0  ;;  %v3402_v40 = vpop.f32.mrf.mxu1  ;;  %v3408_v50 = vshll.u32 %v933_v36, 8 }
  0xcd   :  { %vm215_vm3 = vcmp.gt.s32.totalorder %v214_v34, 0  ;;  %vm936_vm4 = vcmp.gt.s32.totalorder %v935_v37, 0  ;;  %v2987_v42 = vadd.s32 4294967169, %v311_v38 }
  0xce   :  { %v216_v41 = vsel %vm215_vm3, %v214_v34, 0  ;;  %v3112_v43 = vpop.f32.mrf.mxu0  ;;  %v3133_v44 = vpop.f32.mrf.mxu1  ;;  %v937_v47 = vsel %vm936_vm4, %v935_v37, 0  ;;  %vm927_vm3 = vcmp.lt.s32.totalorder %v3385_v16, 0 }
  0xcf   :  { %v217_v45 = vshrl.u32 %v216_v41, 5  ;;  %v218_v46 = vand.u32 31, %v216_v41  ;;  %v3406_v49 = vshrl.u32 %v937_v47, 5  ;;  %v939_v56 = vand.u32 31, %v937_v47 }
  0xd0   :  { %v3411_v52 = vpop.f32.mrf.mxu0  ;;  %v3414_v57 = vadd.s32 1, %v2987_v42  ;;  %v3432_v31 = vpop.f32.mrf.mxu1 }
  0xd1   :  { %v219_v53 = vsub.s32 32, %v218_v46  ;;  %v221_v55 = vshll.u32 %v3286_v54, %v218_v46  ;;  %v224_v59 = vshll.u32 %v3287_v58, %v218_v46  ;;  %v227_v61 = vshll.u32 %v3288_v60, %v218_v46 }
  0xd2   :  { %v230_v63 = vshll.u32 %v3289_v62, %v218_v46  ;;  %v233_v1 = vshll.u32 %v3290_v0, %v218_v46  ;;  %v3115_v2 = vpop.f32.mrf.mxu0  ;;  %vm236_vm5 = vcmp.lt.s32.totalorder %v217_v45, 1  ;;  %vm238_vm6 = vcmp.lt.s32.totalorder %v217_v45, 3  ;;  %v3136_v41 = vpop.f32.mrf.mxu1 }
  0xd3   :  { %v222_v3 = vshrl.u32 %v3287_v58, %v219_v53  ;;  %v225_v4 = vshrl.u32 %v3288_v60, %v219_v53  ;;  %v228_v5 = vshrl.u32 %v3289_v62, %v219_v53  ;;  %v220_v6 = vshrl.u32 %v3286_v54, %v219_v53 }
  0xd4   :  { %v231_v7 = vshrl.u32 %v3290_v0, %v219_v53  ;;  %v234_v9 = vshrl.u32 %v3291_v8, %v219_v53  ;;  %v940_v13 = vsub.s32 32, %v939_v56  ;;  %vm239_vm7 = vcmp.lt.s32.totalorder %v217_v45, 4 }
  0xd5   :  { %v223_v10 = vor.u32 %v222_v3, %v221_v55  ;;  %v226_v11 = vor.u32 %v225_v4, %v224_v59  ;;  %v229_v12 = vor.u32 %v228_v5, %v227_v61  ;;  %v942_v20 = vshll.u32 %v3286_v54, %v939_v56 }
  0xd6   :  { %v232_v14 = vor.u32 %v231_v7, %v230_v63  ;;  %v235_v18 = vor.u32 %v234_v9, %v233_v1  ;;  %v945_v30 = vshll.u32 %v3287_v58, %v939_v56  ;;  %vm237_vm8 = vcmp.lt.s32.totalorder %v217_v45, 2 }
  0xd7   :  { %v240_v21 = vsel %vm236_vm5, %v220_v6, %v223_v10  ;;  %v241_v22 = vsel %vm239_vm7, %v229_v12, 2102212464  ;;  %v244_v23 = vsel %vm236_vm5, %v223_v10, %v226_v11  ;;  %v248_v24 = vsel %vm236_vm5, %v226_v11, %v229_v12 }
  0xd8   :  { %v242_v25 = vsel %vm238_vm6, %v226_v11, %v241_v22  ;;  %v245_v26 = vsel %vm239_vm7, %v232_v14, 920167782  ;;  %v249_v29 = vsel %vm239_vm7, %v235_v18, 1326507024  ;;  %v943_v34 = vshrl.u32 %v3287_v58, %v940_v13 }
  0xd9   :  { %v246_v32 = vsel %vm238_vm6, %v229_v12, %v245_v26  ;;  %v250_v33 = vsel %vm238_vm6, %v232_v14, %v249_v29  ;;  %v243_v35 = vsel %vm237_vm8, %v240_v21, %v242_v25  ;;  %v946_v38 = vshrl.u32 %v3288_v60, %v940_v13 }
  0xda   :  { %v247_v36 = vsel %vm237_vm8, %v244_v23, %v246_v32  ;;  %v251_v37 = vsel %vm237_vm8, %v248_v24, %v250_v33  ;;  %v944_v47 = vor.u32 %v943_v34, %v942_v20  ;;  %v948_v53 = vshll.u32 %v3288_v60, %v939_v56 }
  0xdb   :  { %v3439_v42 = vmul.u32.u64.low %v3404_v48, %v251_v37  ;;  %v3440_v43 = vmul.u32.u64.high %v3404_v48, %v251_v37, %v3439_v42  ;;  %v3443_v44 = vmul.u32.u64.low %v3404_v48, %v247_v36  ;;  %v3444_v46 = vmul.u32.u64.high %v3404_v48, %v247_v36, %v3443_v44 }
  0xdc   :  { %v947_v45 = vor.u32 %v946_v38, %v945_v30  ;;  %v949_v55 = vshrl.u32 %v3289_v62, %v940_v13  ;;  %v951_v59 = vshll.u32 %v3289_v62, %v939_v56  ;;  %v952_v61 = vshrl.u32 %v3290_v0, %v940_v13 }
  0xdd   :  { %v954_v63 = vshll.u32 %v3290_v0, %v939_v56  ;;  %v955_v1 = vshrl.u32 %v3291_v8, %v940_v13  ;;  %v259_v2 = vmul.u32 %v3404_v48, %v243_v35  ;;  %v941_v3 = vshrl.u32 %v3286_v54, %v940_v13 }
  0xde   :  { %v950_v4 = vor.u32 %v949_v55, %v948_v53  ;;  %vm957_vm9 = vcmp.lt.s32.totalorder %v3406_v49, 1  ;;  %vm261_vm10 = vc.u32 %v3440_v43, %v3443_v44  ;;  %v262_v5 = vadd.s32 1, %v3444_v46 }
  0xdf   :  { %v953_v6 = vor.u32 %v952_v61, %v951_v59  ;;  %vm958_vm11 = vcmp.lt.s32.totalorder %v3406_v49, 2  ;;  %v956_v7 = vor.u32 %v955_v1, %v954_v63  ;;  %vm959_vm12 = vcmp.lt.s32.totalorder %v3406_v49, 3 }
  0xe0   :  { %vm960_vm13 = vcmp.lt.s32.totalorder %v3406_v49, 4  ;;  %v965_v56 = vsel %vm957_vm9, %v944_v47, %v947_v45  ;;  %v263_v48 = vsel %vm261_vm10, %v262_v5, %v3444_v46  ;;  %v969_v11 = vsel %vm957_vm9, %v947_v45, %v950_v4 }
  0xe1   :  { %v962_v9 = vsel %vm960_vm13, %v950_v4, 2102212464  ;;  %v966_v10 = vsel %vm960_vm13, %v953_v6, 920167782  ;;  %v264_v12 = vadd.s32 %v263_v48, %v259_v2  ;;  %v961_v13 = vsel %vm957_vm9, %v941_v3, %v944_v47 }
  0xe2   :  { %v967_v14 = vsel %vm959_vm12, %v950_v4, %v966_v10  ;;  %v970_v18 = vsel %vm960_vm13, %v956_v7, 1326507024  ;;  %v963_v20 = vsel %vm959_vm12, %v947_v45, %v962_v9  ;;  %vm318_vm14 = vcmp.gt.s32.totalorder %v3414_v57, 0 }
  0xe3   :  { %v968_v21 = vsel %vm958_vm11, %v965_v56, %v967_v14  ;;  %v971_v22 = vsel %vm959_vm12, %v953_v6, %v970_v18  ;;  %v265_v23 = vadd.s32 536870912, %v264_v12  ;;  %v964_v33 = vsel %vm958_vm11, %v961_v13, %v963_v20 }
  0xe4   :  { %v972_v24 = vsel %vm958_vm11, %v969_v11, %v971_v22  ;;  %v3469_v25 = vmul.u32.u64.low %v3408_v50, %v968_v21  ;;  %v3470_v26 = vmul.u32.u64.high %v3408_v50, %v968_v21, %v3469_v25  ;;  %v319_v34 = vsel %vm318_vm14, %v3414_v57, 0 }
  0xe5   :  { %v3473_v29 = vmul.u32.u64.low %v3408_v50, %v972_v24  ;;  %v3474_v30 = vmul.u32.u64.high %v3408_v50, %v972_v24, %v3473_v29  ;;  %v266_v32 = vshrl.u32 %v265_v23, 30  ;;  %v314_v37 = vand.u32 8388607, %v307_v51 }
  0xe6   :  { %v983_v36 = vadd.s32 1, %v3470_v26  ;;  %v980_v38 = vmul.u32 %v3408_v50, %v964_v33  ;;  %v1031_v41 = vand.u32 2139095040, %v3397_v28  ;;  %v321_v47 = vand.u32 31, %v319_v34  ;;  %v3528_v29 = vpop.f32.mrf.mxu0 }
  0xe7   :  { %v267_v35 = vshll.u32 %v266_v32, 30  ;;  %vm982_vm15 = vc.u32 %v3474_v30, %v3469_v25  ;;  %v290_v49 = vsub.s32 4, %v266_v32  ;;  %v315_v57 = vor.u32 8388608, %v314_v37 }
  0xe8   :  { %v984_v46 = vsel %vm982_vm15, %v983_v36, %v3470_v26  ;;  %v1032_v59 = vshrl.u32 %v1031_v41, 23  ;;  %v322_v63 = vsub.s32 32, %v321_v47  ;;  %v1028_v3 = vand.u32 2147483647, %v3397_v28  ;;  %v3118_v41 = vpop.f32.mrf.mxu0 }
  0xe9   :  { %v268_v42 = vsub.s32 %v264_v12, %v267_v35  ;;  %v985_v45 = vadd.s32 %v984_v46, %v980_v38  ;;  %v291_v1 = vsel %vm206_vm0, %v290_v49, %v266_v32  ;;  %v260_v4 = vadd.s32 %v3443_v44, %v3440_v43 }
  0xea   :  { %v3500_v6 = vshrl.u32 %v319_v34, 5  ;;  %v3502_v7 = vshll.u32 %v315_v57, 8  ;;  %v3505_v17 = vadd.s32 %v3469_v25, %v3474_v30  ;;  %v324_v48 = vshll.u32 %v3286_v54, %v321_v47 }
  0xeb   :  { %v270_v53 = vsub.s32 0, %v268_v42  ;;  %v986_v55 = vadd.s32 536870912, %v985_v45  ;;  %v3015_v9 = vadd.s32 4294967169, %v1032_v59  ;;  %v3511_v11 = vsel %vm3489_vm1, 0, %v291_v1 }
  0xec   :  { %v327_v43 = vshll.u32 %v3287_v58, %v321_v47  ;;  %v334_v44 = vshrl.u32 %v3290_v0, %v322_v63  ;;  %v325_v13 = vshrl.u32 %v3287_v58, %v322_v63  ;;  %v328_v14 = vshrl.u32 %v3288_v60, %v322_v63 }
  0xed   :  { %v2984_v61 = vmin.u32 %v270_v53, %v268_v42  ;;  %v3495_v2 = vshrl.u32 %v986_v55, 30  ;;  %v331_v18 = vshrl.u32 %v3289_v62, %v322_v63  ;;  %v323_v20 = vshrl.u32 %v3286_v54, %v322_v63 }
  0xee   :  { %v333_v21 = vshll.u32 %v3289_v62, %v321_v47  ;;  %v337_v22 = vshrl.u32 %v3291_v8, %v322_v63  ;;  %v3524_v24 = vadd.s32 3, %v3511_v11  ;;  %v330_v26 = vshll.u32 %v3288_v60, %v321_v47 }
  0xef   :  { %v272_v5 = vclz %v2984_v61  ;;  %v988_v56 = vshll.u32 %v3495_v2, 30  ;;  %v336_v34 = vshll.u32 %v3290_v0, %v321_v47  ;;  %v326_v36 = vor.u32 %v325_v13, %v324_v48 }
  0xf0   :  { %v335_v33 = vor.u32 %v334_v44, %v333_v21  ;;  %v329_v37 = vor.u32 %v328_v14, %v327_v43  ;;  %v332_v38 = vor.u32 %v331_v18, %v330_v26  ;;  %v1011_v55 = vsub.s32 4, %v3495_v2 }
  0xf1   :  { %v2985_v10 = vadd.s32 4294967294, %v272_v5  ;;  %v3515_v12 = vsub.s32 %v985_v45, %v988_v56  ;;  %v338_v53 = vor.u32 %v337_v22, %v336_v34  ;;  %vm339_vm4 = vcmp.lt.s32.totalorder %v3500_v6, 1 }
  0xf2   :  { %vm342_vm5 = vcmp.lt.s32.totalorder %v3500_v6, 4  ;;  %vm340_vm6 = vcmp.lt.s32.totalorder %v3500_v6, 2  ;;  %vm341_vm7 = vcmp.lt.s32.totalorder %v3500_v6, 3  ;;  %v351_v1 = vsel %vm339_vm4, %v329_v37, %v332_v38 }
  0xf3   :  { %vm2986_vm2 = vcmp.lt.s32.totalorder %v2985_v10, 0  ;;  %v991_v25 = vsub.s32 0, %v3515_v12  ;;  %v348_v61 = vsel %vm342_vm5, %v335_v33, 920167782  ;;  %v344_v5 = vsel %vm342_vm5, %v332_v38, 2102212464 }
  0xf4   :  { %v275_v23 = vsel %vm2986_vm2, 0, %v2985_v10  ;;  %v349_v56 = vsel %vm341_vm7, %v332_v38, %v348_v61  ;;  %v352_v48 = vsel %vm342_vm5, %v338_v53, 1326507024  ;;  %vm3546_vm8 = vcmp.le.f32.partialorder %v925_v19, 0.7853982 }
  0xf5   :  { %v276_v30 = vsub.s32 32, %v275_v23  ;;  %v280_v32 = vsub.s32 4294967266, %v275_v23  ;;  %v3012_v35 = vmin.u32 %v991_v25, %v3515_v12  ;;  %v277_v46 = vshll.u32 %v268_v42, %v275_v23 }
  0xf6   :  { %v347_v42 = vsel %vm339_vm4, %v326_v36, %v329_v37  ;;  %v343_v44 = vsel %vm339_vm4, %v323_v20, %v326_v36  ;;  %v353_v13 = vsel %vm341_vm7, %v335_v33, %v352_v48  ;;  %v345_v25 = vsel %vm341_vm7, %v329_v37, %v344_v5 }
  0xf7   :  { %v278_v49 = vshrl.u32 %v260_v4, %v276_v30  ;;  %v281_v45 = vadd.s32 127, %v280_v32  ;;  %v993_v57 = vclz %v3012_v35  ;;  %v350_v21 = vsel %vm340_vm6, %v347_v42, %v349_v56 }
  0xf8   :  { %v354_v22 = vsel %vm340_vm6, %v351_v1, %v353_v13  ;;  %v1038_v26 = vadd.s32 1, %v3015_v9  ;;  %v3567_v36 = vmul.u32.u64.low %v3502_v7, %v350_v21  ;;  %v3568_v38 = vmul.u32.u64.high %v3502_v7, %v350_v21, %v3567_v36 }
  0xf9   :  { %v279_v47 = vor.u32 %v278_v49, %v277_v46  ;;  %v282_v59 = vshll.u32 %v281_v45, 23  ;;  %v3013_v63 = vadd.s32 4294967294, %v993_v57  ;;  %v1012_v9 = vsel %vm927_vm3, %v1011_v55, %v3495_v2 }
  0xfa   :  { %v3562_v32 = vmul.u32.u64.low %v3502_v7, %v354_v22  ;;  %v3563_v33 = vmul.u32.u64.high %v3502_v7, %v354_v22, %v3562_v32  ;;  %vm1039_vm10 = vcmp.gt.s32.totalorder %v1038_v26, 0  ;;  %v3583_v53 = vand.u32 3, %v3511_v11 }
  0xfb   :  { %v283_v4 = vor.u32 4788187, %v282_v59  ;;  %v286_v10 = vcvt.s32.f32 %v279_v47  ;;  %vm3014_vm9 = vcmp.lt.s32.totalorder %v3013_v63, 0  ;;  %v1040_v49 = vsel %vm1039_vm10, %v1038_v26, 0 }
  0xfc   :  { %v996_v18 = vsel %vm3014_vm9, 0, %v3013_v63  ;;  %vm364_vm11 = vc.u32 %v3563_v33, %v3567_v36  ;;  %v410_v2 = vand.u32 2147483647, %v3400_v39  ;;  %v3592_v55 = vand.u32 3, %v3524_v24 }
  0xfd   :  { %v284_v14 = vand.u32 2147483647, %v283_v4  ;;  %v997_v23 = vsub.s32 32, %v996_v18  ;;  %v1001_v19 = vsub.s32 4294967266, %v996_v18  ;;  %v998_v20 = vshll.u32 %v3515_v12, %v996_v18 }
  0xfe   :  { %v3576_v12 = vand.u32 8388607, %v1028_v3  ;;  %v365_v47 = vadd.s32 1, %v3568_v38  ;;  %v1014_v11 = vsel %vm3546_vm8, 0, %v1012_v9  ;;  %v1042_v61 = vand.u32 31, %v1040_v49 }
  0xff   :  { %v287_v30 = vmul.f32 %v286_v10, %v284_v14  ;;  %v999_v34 = vshrl.u32 %v3505_v17, %v997_v23  ;;  %v1002_v35 = vadd.s32 127, %v1001_v19  ;;  %v346_v17 = vsel %vm340_vm6, %v343_v44, %v345_v25 }
 0x100   :  { %v362_v59 = vmul.u32 %v3502_v7, %v346_v17  ;;  %v366_v1 = vsel %vm364_vm11, %v365_v47, %v3568_v38  ;;  %v1043_v4 = vsub.s32 32, %v1042_v61  ;;  %v1045_v24 = vshll.u32 %v3286_v54, %v1042_v61 }
 0x101   :  { %v288_v41 = vxor.u32 2147483648, %v287_v30  ;;  %v1000_v37 = vor.u32 %v999_v34, %v998_v20  ;;  %v1003_v46 = vshll.u32 %v1002_v35, 23  ;;  %v1048_v5 = vshll.u32 %v3287_v58, %v1042_v61 }
 0x102   :  { %v367_v50 = vadd.s32 %v366_v1, %v362_v59  ;;  %v3601_v48 = vshrl.u32 %v1040_v49, 5  ;;  %v1051_v10 = vshll.u32 %v3288_v60, %v1042_v61  ;;  %v1054_v44 = vshll.u32 %v3289_v62, %v1042_v61 }
 0x103   :  { %v289_v45 = vsel %vm206_vm0, %v288_v41, %v287_v30  ;;  %v1004_v6 = vor.u32 4788187, %v1003_v46  ;;  %v1007_v42 = vcvt.s32.f32 %v1000_v37  ;;  %v1046_v13 = vshrl.u32 %v3287_v58, %v1043_v4  ;;  %v3624_v37 = vpop.f32.mrf.mxu1 }
 0x104   :  { %v292_v57 = vsel %vm3489_vm1, %v3383_v15, %v289_v45  ;;  %v368_v7 = vadd.s32 536870912, %v367_v50  ;;  %v1049_v14 = vshrl.u32 %v3288_v60, %v1043_v4  ;;  %v1057_v18 = vshll.u32 %v3290_v0, %v1042_v61 }
 0x105   :  { %3208 = vcosq.f32 %v292_v57  ;;  %v1005_v63 = vand.u32 2147483647, %v1004_v6  ;;  %v1052_v22 = vshrl.u32 %v3289_v62, %v1043_v4  ;;  %v1055_v23 = vshrl.u32 %v3290_v0, %v1043_v4  ;;  %v3139_v45 = vpop.f32.mrf.mxu1 }
 0x106   :  { %3210 = vsinq.f32 %v292_v57  ;;  %v1058_v19 = vshrl.u32 %v3291_v8, %v1043_v4  ;;  %v2396_v25 = vadd.s32 3, %v1014_v11  ;;  %v3611_v26 = vshrl.u32 %v368_v7, 30 }
 0x107   :  { %v1008_v56 = vmul.f32 %v1007_v42, %v1005_v63  ;;  %v1047_v30 = vor.u32 %v1046_v13, %v1045_v24  ;;  %v1050_v20 = vor.u32 %v1049_v14, %v1048_v5  ;;  %vm302_vm12 = vcmp.eq.s32.totalorder %v3583_v53, 2 }
 0x108   :  { %v1036_v34 = vor.u32 8388608, %v3576_v12  ;;  %v1053_v35 = vor.u32 %v1052_v22, %v1051_v10  ;;  %v1056_v38 = vor.u32 %v1055_v23, %v1054_v44  ;;  %vm299_vm13 = vcmp.eq.s32.totalorder %v3583_v53, 0 }
 0x109   :  { %v1009_v21 = vxor.u32 2147483648, %v1008_v56  ;;  %v370_v9 = vshll.u32 %v3611_v26, 30  ;;  %vm1060_vm14 = vcmp.lt.s32.totalorder %v3601_v48, 1  ;;  %vm1063_vm15 = vcmp.lt.s32.totalorder %v3601_v48, 4 }
 0x10a   :  { %vm298_vm0 = vcmp.lt.s32.totalorder %v3583_v53, 2  ;;  %vm1670_vm1 = vcmp.lt.s32.totalorder %v3592_v55, 2  ;;  %v1059_v12 = vor.u32 %v1058_v19, %v1057_v18  ;;  %v1068_v46 = vsel %vm1060_vm14, %v1047_v30, %v1050_v20  ;;  %v3677_v19 = vld [vmem:[%s4544_s2] ss:$0 sm:$0xff] }
 0x10b   :  { %v1010_v32 = vsel %vm927_vm3, %v1009_v21, %v1008_v56  ;;  %v1069_v43 = vsel %vm1063_vm15, %v1056_v38, 920167782  ;;  %vm296_vm2 = vweird.f32 %v3383_v15  ;;  %v3633_v17 = vand.u32 3, %v1014_v11 }
 0x10c   :  { %v1013_v41 = vsel %vm3546_vm8, %v3385_v16, %v1010_v32  ;;  %v3635_v49 = vsub.s32 %v367_v50, %v370_v9  ;;  %vm1062_vm3 = vcmp.lt.s32.totalorder %v3601_v48, 3  ;;  %v1044_v57 = vshrl.u32 %v3286_v54, %v1043_v4 }
 0x10d   :  { %3212 = vcosq.f32 %v1013_v41  ;;  %vm1061_vm4 = vcmp.lt.s32.totalorder %v3601_v48, 2  ;;  %v1070_v6 = vsel %vm1062_vm3, %v1053_v35, %v1069_v43  ;;  %v3642_v47 = vshll.u32 %v1036_v34, 8 }
 0x10e   :  { %3214 = vsinq.f32 %v1013_v41  ;;  %v3644_v59 = vand.u32 3, %v2396_v25  ;;  %v373_v61 = vsub.s32 0, %v3635_v49  ;;  %v1065_v11 = vsel %vm1063_vm15, %v1053_v35, 2102212464 }
 0x10f   :  { %v1071_v63 = vsel %vm1061_vm4, %v1068_v46, %v1070_v6  ;;  %v1072_v1 = vsel %vm1060_vm14, %v1050_v20, %v1053_v35  ;;  %v1073_v50 = vsel %vm1063_vm15, %v1059_v12, 1326507024  ;;  %vm1671_vm5 = vcmp.eq.s32.totalorder %v3592_v55, 0 }
 0x110   :  { %v3656_v4 = vmul.u32.u64.low %v3642_v47, %v1071_v63  ;;  %v3657_v24 = vmul.u32.u64.high %v3642_v47, %v1071_v63, %v3656_v4  ;;  %vm1674_vm6 = vcmp.eq.s32.totalorder %v3592_v55, 2  ;;  %v2988_v10 = vmin.u32 %v373_v61, %v3635_v49 }
 0x111   :  { %v1064_v7 = vsel %vm1060_vm14, %v1044_v57, %v1047_v30  ;;  %v1066_v13 = vsel %vm1062_vm3, %v1050_v20, %v1065_v11  ;;  %v1074_v14 = vsel %vm1062_vm3, %v1056_v38, %v1073_v50  ;;  %vm1023_vm7 = vcmp.eq.s32.totalorder %v3633_v17, 2 }
 0x112   :  { %v3209_v42 = vpop.eup %3208  ;;  %v375_v22 = vclz %v2988_v10  ;;  %v1075_v23 = vsel %vm1061_vm4, %v1072_v1, %v1074_v14  ;;  %vm1020_vm8 = vcmp.eq.s32.totalorder %v3633_v17, 0  ;;  %vm2399_vm9 = vcmp.eq.s32.totalorder %v3644_v59, 0 }
 0x113   :  { %v3211_v5 = vpop.eup %3210  ;;  %v303_v56 = vxor.u32 2147483648, %v3209_v42  ;;  %v413_v20 = vand.u32 2139095040, %v3400_v39  ;;  %vm1019_vm10 = vcmp.lt.s32.totalorder %v3633_v17, 2  ;;  %vm2398_vm11 = vcmp.lt.s32.totalorder %v3644_v59, 2 }
 0x114   :  { %v300_v44 = vxor.u32 2147483648, %v3211_v5  ;;  %v2989_v35 = vadd.s32 4294967294, %v375_v22  ;;  %v1067_v38 = vsel %vm1061_vm4, %v1064_v7, %v1066_v13  ;;  %v1086_v48 = vadd.s32 1, %v3657_v24 }
 0x115   :  { %v304_v18 = vsel %vm302_vm12, %v303_v56, %v3211_v5  ;;  %v1676_v21 = vsel %vm1674_vm6, %v303_v56, %v3211_v5  ;;  %vm1017_vm12 = vweird.f32 %v3385_v16  ;;  %vm2402_vm15 = vcmp.eq.s32.totalorder %v3644_v59, 2 }
 0x116   :  { %v301_v25 = vsel %vm299_vm13, %v3209_v42, %v300_v44  ;;  %v1673_v30 = vsel %vm1671_vm5, %v3209_v42, %v300_v44  ;;  %vm309_vm13 = vcmp.lt.s32.totalorder %v3395_v27, 0  ;;  %vm2990_vm14 = vcmp.lt.s32.totalorder %v2989_v35, 0 }
 0x117   :  { %v305_v32 = vsel %vm298_vm0, %v301_v25, %v304_v18  ;;  %v1677_v34 = vsel %vm1670_vm1, %v1673_v30, %v1676_v21  ;;  %v3699_v53 = vmul.u32.u64.low %v3642_v47, %v1075_v23  ;;  %v3700_v55 = vmul.u32.u64.high %v3642_v47, %v1075_v23, %v3699_v53 }
 0x118   :  { %v306_v41 = vsel %vm296_vm2, nan, %v305_v32  ;;  %v1678_v9 = vsel %vm296_vm2, nan, %v1677_v34  ;;  %v363_v15 = vadd.s32 %v3567_v36, %v3563_v33  ;;  %v378_v43 = vsel %vm2990_vm14, 0, %v2989_v35 }
 0x119   :  { %v1549_v12 = vmul.f32 %v3677_v19, %v306_v41  ;;  %v2927_v46 = vmul.f32 %v3677_v19, %v1678_v9  ;;  %v414_v45 = vshrl.u32 %v413_v20, 23  ;;  %vm3710_vm0 = vcmp.le.f32.partialorder %v307_v51, 0.7853982 }
 0x11a   :  { %v3213_v57 = vpop.eup %3212  ;;  %v379_v61 = vsub.s32 32, %v378_v43  ;;  %v383_v11 = vsub.s32 4294967266, %v378_v43  ;;  %v393_v63 = vsub.s32 4, %v3611_v26  ;;  %v1083_v42 = vmul.u32 %v3642_v47, %v1067_v38 }
 0x11b   :  { %1562 = vst [vmem:[#allocation2] sm:$0xff] %v1549_v12  ;;  %2940 = vst [vmem:[#allocation2 + $0x8] sm:$0xff] %v2927_v46  ;;  %v3215_v1 = vpop.eup %3214  ;;  %v1024_v50 = vxor.u32 2147483648, %v3213_v57  ;;  %v380_v33 = vshll.u32 %v3635_v49, %v378_v43  ;;  %vm1085_vm1 = vc.u32 %v3700_v55, %v3656_v4  ;;  %v2991_v36 = vadd.s32 4294967169, %v414_v45 }
 0x11c   :  { %v1021_v5 = vxor.u32 2147483648, %v3215_v1  ;;  %v381_v56 = vshrl.u32 %v363_v15, %v379_v61  ;;  %v384_v51 = vadd.s32 127, %v383_v11  ;;  %v1087_v10 = vsel %vm1085_vm1, %v1086_v48, %v3657_v24 }
 0x11d   :  { %v1025_v44 = vsel %vm1023_vm7, %v1024_v50, %v3215_v1  ;;  %v2404_v7 = vsel %vm2402_vm15, %v1024_v50, %v3215_v1  ;;  %v1088_v47 = vadd.s32 %v1087_v10, %v1083_v42  ;;  %v420_v13 = vadd.s32 1, %v2991_v36 }
 0x11e   :  { %v1022_v49 = vsel %vm1020_vm8, %v3213_v57, %v1021_v5  ;;  %v2401_v14 = vsel %vm2399_vm9, %v3213_v57, %v1021_v5  ;;  %v382_v18 = vor.u32 %v381_v56, %v380_v33  ;;  %v385_v21 = vshll.u32 %v384_v51, 23 }
 0x11f   :  { %v1026_v22 = vsel %vm1019_vm10, %v1022_v49, %v1025_v44  ;;  %v2405_v24 = vsel %vm2398_vm11, %v2401_v14, %v2404_v7  ;;  %v1089_v23 = vadd.s32 536870912, %v1088_v47  ;;  %vm421_vm2 = vcmp.gt.s32.totalorder %v420_v13, 0 }
 0x120   :  { %v1027_v25 = vsel %vm1017_vm12, nan, %v1026_v22  ;;  %v2406_v30 = vsel %vm1017_vm12, nan, %v2405_v24  ;;  %v386_v20 = vor.u32 4788187, %v385_v21  ;;  %v394_v32 = vsel %vm309_vm13, %v393_v63, %v3611_v26 }
 0x121   :  { %v1556_v34 = vmul.f32 %v3677_v19, %v1027_v25  ;;  %v2934_v17 = vmul.f32 %v3677_v19, %v2406_v30  ;;  %v3741_v35 = vshrl.u32 %v1089_v23, 30  ;;  %v422_v59 = vsel %vm421_vm2, %v420_v13, 0 }
 0x122   :  { %v387_v38 = vand.u32 2147483647, %v386_v20  ;;  %v389_v41 = vcvt.s32.f32 %v382_v18  ;;  %v417_v9 = vand.u32 8388607, %v410_v2  ;;  %v424_v53 = vand.u32 31, %v422_v59 }
 0x123   :  { %1569 = vst [vmem:[#allocation2 + $0x70] sm:$0xff] %v1556_v34  ;;  %2947 = vst [vmem:[#allocation2 + $0x78] sm:$0xff] %v2934_v17  ;;  %v396_v16 = vsel %vm3710_vm0, 0, %v394_v32  ;;  %v1091_v26 = vshll.u32 %v3741_v35, 30  ;;  %v423_v11 = vshrl.u32 %v422_v59, 5  ;;  %v1084_v6 = vadd.s32 %v3656_v4, %v3700_v55 }
 0x124   :  { %v390_v12 = vmul.f32 %v389_v41, %v387_v38  ;;  %v425_v46 = vsub.s32 32, %v424_v53  ;;  %v1772_v43 = vadd.s32 3, %v396_v16  ;;  %v418_v45 = vor.u32 8388608, %v417_v9 }
 0x125   :  { %v3748_v48 = vsub.s32 %v1088_v47, %v1091_v26  ;;  %v427_v63 = vshll.u32 %v3286_v54, %v424_v53  ;;  %v430_v50 = vshll.u32 %v3287_v58, %v424_v53  ;;  %v433_v51 = vshll.u32 %v3288_v60, %v424_v53 }
 0x126   :  { %v391_v15 = vxor.u32 2147483648, %v390_v12  ;;  %v428_v57 = vshrl.u32 %v3287_v58, %v425_v46  ;;  %v431_v42 = vshrl.u32 %v3288_v60, %v425_v46  ;;  %v434_v33 = vshrl.u32 %v3289_v62, %v425_v46 }
 0x127   :  { %v1094_v61 = vsub.s32 0, %v3748_v48  ;;  %v437_v36 = vshrl.u32 %v3290_v0, %v425_v46  ;;  %v436_v10 = vshll.u32 %v3289_v62, %v424_v53  ;;  %v3765_v44 = vand.u32 3, %v396_v16  ;;  %v3785_v16 = vpop.f32.mrf.mxu0 }
 0x128   :  { %v392_v1 = vsel %vm309_vm13, %v391_v15, %v390_v12  ;;  %v429_v7 = vor.u32 %v428_v57, %v427_v63  ;;  %v432_v47 = vor.u32 %v431_v42, %v430_v50  ;;  %v435_v49 = vor.u32 %v434_v33, %v433_v51 }
 0x129   :  { %v395_v5 = vsel %vm3710_vm0, %v3395_v27, %v392_v1  ;;  %v3016_v56 = vmin.u32 %v1094_v61, %v3748_v48  ;;  %v438_v14 = vor.u32 %v437_v36, %v436_v10  ;;  %v3767_v18 = vand.u32 3, %v1772_v43  ;;  %v3121_v63 = vpop.f32.mrf.mxu0 }
 0x12a   :  { %3216 = vcosq.f32 %v395_v5  ;;  %v1114_v21 = vsub.s32 4, %v3741_v35  ;;  %v3772_v22 = vshll.u32 %v418_v45, 8  ;;  %v439_v23 = vshll.u32 %v3290_v0, %v424_v53 }
 0x12b   :  { %3218 = vsinq.f32 %v395_v5  ;;  %v1096_v13 = vclz %v3016_v56  ;;  %v440_v25 = vshrl.u32 %v3291_v8, %v425_v46  ;;  %vm442_vm3 = vcmp.lt.s32.totalorder %v423_v11, 1 }
 0x12c   :  { %vm1030_vm4 = vcmp.lt.s32.totalorder %v3397_v28, 0  ;;  %v426_v30 = vshrl.u32 %v3286_v54, %v425_v46  ;;  %vm444_vm5 = vcmp.lt.s32.totalorder %v423_v11, 3  ;;  %vm445_vm6 = vcmp.lt.s32.totalorder %v423_v11, 4 }
 0x12d   :  { %v3017_v24 = vadd.s32 4294967294, %v1096_v13  ;;  %v450_v20 = vsel %vm442_vm3, %v429_v7, %v432_v47  ;;  %v441_v4 = vor.u32 %v440_v25, %v439_v23  ;;  %v447_v55 = vsel %vm445_vm6, %v435_v49, 2102212464 }
 0x12e   :  { %v451_v32 = vsel %vm445_vm6, %v438_v14, 920167782  ;;  %v446_v17 = vsel %vm442_vm3, %v426_v30, %v429_v7  ;;  %v448_v59 = vsel %vm444_vm5, %v432_v47, %v447_v55  ;;  %vm443_vm8 = vcmp.lt.s32.totalorder %v423_v11, 2 }
 0x12f   :  { %vm3018_vm7 = vcmp.lt.s32.totalorder %v3017_v24, 0  ;;  %v452_v38 = vsel %vm444_vm5, %v435_v49, %v451_v32  ;;  %v454_v53 = vsel %vm442_vm3, %v432_v47, %v435_v49  ;;  %vm402_vm9 = vcmp.eq.s32.totalorder %v3765_v44, 0 }
 0x130   :  { %v1099_v34 = vsel %vm3018_vm7, 0, %v3017_v24  ;;  %v453_v12 = vsel %vm443_vm8, %v450_v20, %v452_v38  ;;  %v455_v46 = vsel %vm445_vm6, %v441_v4, 1326507024  ;;  %v1134_v15 = vand.u32 2139095040, %v3402_v40 }
 0x131   :  { %v1100_v41 = vsub.s32 32, %v1099_v34  ;;  %v1104_v9 = vsub.s32 4294967266, %v1099_v34  ;;  %v1101_v26 = vshll.u32 %v3748_v48, %v1099_v34  ;;  %vm401_vm10 = vcmp.lt.s32.totalorder %v3765_v44, 2 }
 0x132   :  { %vm3795_vm11 = vcmp.le.f32.partialorder %v1028_v3, 0.7853982  ;;  %v449_v61 = vsel %vm443_vm8, %v446_v17, %v448_v59  ;;  %v456_v48 = vsel %vm444_vm5, %v438_v14, %v455_v46  ;;  %vm399_vm12 = vweird.f32 %v3395_v27 }
 0x133   :  { %v1102_v45 = vshrl.u32 %v1084_v6, %v1100_v41  ;;  %v1105_v57 = vadd.s32 127, %v1104_v9  ;;  %v457_v42 = vsel %vm443_vm8, %v454_v53, %v456_v48  ;;  %v1135_v3 = vshrl.u32 %v1134_v15, 23 }
 0x134   :  { %v3804_v1 = vmul.u32.u64.low %v3772_v22, %v453_v12  ;;  %v3805_v50 = vmul.u32.u64.high %v3772_v22, %v453_v12, %v3804_v1  ;;  %v3809_v5 = vmul.u32.u64.low %v3772_v22, %v457_v42  ;;  %v3810_v56 = vmul.u32.u64.high %v3772_v22, %v457_v42, %v3809_v5 }
 0x135   :  { %v1103_v33 = vor.u32 %v1102_v45, %v1101_v26  ;;  %v1106_v36 = vshll.u32 %v1105_v57, 23  ;;  %vm405_vm13 = vcmp.eq.s32.totalorder %v3765_v44, 2  ;;  %vm1774_vm14 = vcmp.lt.s32.totalorder %v3767_v18, 2 }
 0x136   :  { %vm1775_vm15 = vcmp.eq.s32.totalorder %v3767_v18, 0  ;;  %v3019_v11 = vadd.s32 4294967169, %v1135_v3  ;;  %vm1778_vm0 = vcmp.eq.s32.totalorder %v3767_v18, 2  ;;  %v1115_v7 = vsel %vm1030_vm4, %v1114_v21, %v3741_v35 }
 0x137   :  { %v3217_v51 = vpop.eup %3216  ;;  %v1107_v10 = vor.u32 4788187, %v1106_v36  ;;  %v1131_v47 = vand.u32 2147483647, %v3402_v40  ;;  %v465_v14 = vmul.u32 %v3772_v22, %v449_v61  ;;  %v468_v6 = vadd.s32 1, %v3805_v50 }
 0x138   :  { %v3219_v13 = vpop.eup %3218  ;;  %v406_v49 = vxor.u32 2147483648, %v3217_v51  ;;  %v1141_v24 = vadd.s32 1, %v3019_v11  ;;  %v1110_v30 = vcvt.s32.f32 %v1103_v33  ;;  %vm467_vm1 = vc.u32 %v3810_v56, %v3804_v1 }
 0x139   :  { %v403_v23 = vxor.u32 2147483648, %v3219_v13  ;;  %v1108_v25 = vand.u32 2147483647, %v1107_v10  ;;  %v469_v35 = vsel %vm467_vm1, %v468_v6, %v3805_v50  ;;  %v1117_v59 = vsel %vm3795_vm11, 0, %v1115_v7  ;;  %v3855_v50 = vpop.f32.mrf.mxu1 }
 0x13a   :  { %v407_v20 = vsel %vm405_vm13, %v406_v49, %v3219_v13  ;;  %v1780_v4 = vsel %vm1778_vm0, %v406_v49, %v3219_v13  ;;  %vm1142_vm2 = vcmp.gt.s32.totalorder %v1141_v24, 0  ;;  %v470_v32 = vadd.s32 %v469_v35, %v465_v14 }
 0x13b   :  { %v404_v21 = vsel %vm402_vm9, %v3217_v51, %v403_v23  ;;  %v1777_v22 = vsel %vm1775_vm15, %v3217_v51, %v403_v23  ;;  %v1111_v55 = vmul.f32 %v1110_v30, %v1108_v25  ;;  %v1143_v38 = vsel %vm1142_vm2, %v1141_v24, 0  ;;  %v3142_v51 = vpop.f32.mrf.mxu1 }
 0x13c   :  { %v408_v34 = vsel %vm401_vm10, %v404_v21, %v407_v20  ;;  %v1781_v17 = vsel %vm1774_vm14, %v1777_v22, %v1780_v4  ;;  %v471_v26 = vadd.s32 536870912, %v470_v32  ;;  %v1145_v46 = vand.u32 31, %v1143_v38 }
 0x13d   :  { %v409_v41 = vsel %vm399_vm12, nan, %v408_v34  ;;  %v1782_v9 = vsel %vm399_vm12, nan, %v1781_v17  ;;  %v1112_v53 = vxor.u32 2147483648, %v1111_v55  ;;  %v2500_v27 = vadd.s32 3, %v1117_v59 }
 0x13e   :  { %v1550_v12 = vmul.f32 %v3677_v19, %v409_v41  ;;  %v2928_v44 = vmul.f32 %v3677_v19, %v1782_v9  ;;  %v3845_v15 = vshrl.u32 %v471_v26, 30  ;;  %v1138_v57 = vand.u32 8388607, %v1131_v47 }
 0x13f   :  { %v1113_v18 = vsel %vm1030_vm4, %v1112_v53, %v1111_v55  ;;  %v1146_v61 = vsub.s32 32, %v1145_v46  ;;  %v1148_v63 = vshll.u32 %v3286_v54, %v1145_v46  ;;  %v1151_v42 = vshll.u32 %v3287_v58, %v1145_v46 }
 0x140   :  { %1563 = vst [vmem:[#allocation2 + $0x10] sm:$0xff] %v1550_v12  ;;  %2941 = vst [vmem:[#allocation2 + $0x18] sm:$0xff] %v2928_v44  ;;  %v1116_v45 = vsel %vm3795_vm11, %v3397_v28, %v1113_v18  ;;  %v473_v48 = vshll.u32 %v3845_v15, 30  ;;  %v1154_v33 = vshll.u32 %v3288_v60, %v1145_v46  ;;  %v1157_v11 = vshll.u32 %v3289_v62, %v1145_v46 }
 0x141   :  { %3220 = vcosq.f32 %v1116_v45  ;;  %v1149_v3 = vshrl.u32 %v3287_v58, %v1146_v61  ;;  %v1152_v43 = vshrl.u32 %v3288_v60, %v1146_v61  ;;  %v1155_v5 = vshrl.u32 %v3289_v62, %v1146_v61 }
 0x142   :  { %3222 = vsinq.f32 %v1116_v45  ;;  %v3860_v36 = vsub.s32 %v470_v32, %v473_v48  ;;  %v3864_v10 = vand.u32 3, %v1117_v59  ;;  %v3866_v7 = vand.u32 3, %v2500_v27 }
 0x143   :  { %v1139_v13 = vor.u32 8388608, %v1138_v57  ;;  %v1158_v49 = vshrl.u32 %v3290_v0, %v1146_v61  ;;  %v1144_v6 = vshrl.u32 %v1143_v38, 5  ;;  %v1150_v24 = vor.u32 %v1149_v3, %v1148_v63 }
 0x144   :  { %v476_v14 = vsub.s32 0, %v3860_v36  ;;  %v516_v23 = vand.u32 2139095040, %v3411_v52  ;;  %v1153_v25 = vor.u32 %v1152_v43, %v1151_v42  ;;  %v1156_v30 = vor.u32 %v1155_v5, %v1154_v33 }
 0x145   :  { %v1160_v20 = vshll.u32 %v3290_v0, %v1145_v46  ;;  %v1161_v4 = vshrl.u32 %v3291_v8, %v1146_v61  ;;  %v1159_v21 = vor.u32 %v1158_v49, %v1157_v11  ;;  %vm1126_vm3 = vcmp.eq.s32.totalorder %v3864_v10, 2 }
 0x146   :  { %v2992_v35 = vmin.u32 %v476_v14, %v3860_v36  ;;  %vm2506_vm4 = vcmp.eq.s32.totalorder %v3866_v7, 2  ;;  %v466_v22 = vadd.s32 %v3804_v1, %v3810_v56  ;;  %v1147_v55 = vshrl.u32 %v3286_v54, %v1146_v61 }
 0x147   :  { %v1162_v32 = vor.u32 %v1161_v4, %v1160_v20  ;;  %v3879_v34 = vshll.u32 %v1139_v13, 8  ;;  %vm1123_vm5 = vcmp.eq.s32.totalorder %v3864_v10, 0  ;;  %vm2503_vm6 = vcmp.eq.s32.totalorder %v3866_v7, 0 }
 0x148   :  { %v478_v17 = vclz %v2992_v35  ;;  %vm1163_vm7 = vcmp.lt.s32.totalorder %v1144_v6, 1  ;;  %vm1166_vm8 = vcmp.lt.s32.totalorder %v1144_v6, 4  ;;  %v517_v59 = vshrl.u32 %v516_v23, 23 }
 0x149   :  { %vm1122_vm9 = vcmp.lt.s32.totalorder %v3864_v10, 2  ;;  %vm2502_vm10 = vcmp.lt.s32.totalorder %v3866_v7, 2  ;;  %v496_v38 = vsub.s32 4, %v3845_v15  ;;  %vm1164_vm11 = vcmp.lt.s32.totalorder %v1144_v6, 2 }
 0x14a   :  { %v1168_v1 = vsel %vm1166_vm8, %v1156_v30, 2102212464  ;;  %v1171_v56 = vsel %vm1163_vm7, %v1150_v24, %v1153_v25  ;;  %vm1120_vm12 = vweird.f32 %v3397_v28  ;;  %vm412_vm13 = vcmp.lt.s32.totalorder %v3400_v39, 0 }
 0x14b   :  { %v2993_v41 = vadd.s32 4294967294, %v478_v17  ;;  %vm1165_vm14 = vcmp.lt.s32.totalorder %v1144_v6, 3  ;;  %v1172_v9 = vsel %vm1166_vm8, %v1159_v21, 920167782  ;;  %v1175_v53 = vsel %vm1163_vm7, %v1153_v25, %v1156_v30 }
 0x14c   :  { %v1167_v26 = vsel %vm1163_vm7, %v1147_v55, %v1150_v24  ;;  %v1169_v12 = vsel %vm1165_vm14, %v1153_v25, %v1168_v1  ;;  %v1173_v44 = vsel %vm1165_vm14, %v1156_v30, %v1172_v9  ;;  %v1176_v46 = vsel %vm1166_vm8, %v1162_v32, 1326507024 }
 0x14d   :  { %vm2994_vm15 = vcmp.lt.s32.totalorder %v2993_v41, 0  ;;  %v1174_v18 = vsel %vm1164_vm11, %v1171_v56, %v1173_v44  ;;  %v1177_v45 = vsel %vm1165_vm14, %v1159_v21, %v1176_v46  ;;  %v2995_v27 = vadd.s32 4294967169, %v517_v59 }
 0x14e   :  { %v3221_v57 = vpop.eup %3220  ;;  %v481_v61 = vsel %vm2994_vm15, 0, %v2993_v41  ;;  %v1178_v48 = vsel %vm1164_vm11, %v1175_v53, %v1177_v45  ;;  %v3894_v63 = vmul.u32.u64.low %v3879_v34, %v1174_v18  ;;  %v3895_v42 = vmul.u32.u64.high %v3879_v34, %v1174_v18, %v3894_v63 }
 0x14f   :  { %v3223_v3 = vpop.eup %3222  ;;  %v1127_v43 = vxor.u32 2147483648, %v3221_v57  ;;  %v482_v33 = vsub.s32 32, %v481_v61  ;;  %v486_v5 = vsub.s32 4294967266, %v481_v61  ;;  %v1170_v11 = vsel %vm1164_vm11, %v1167_v26, %v1169_v12 }
 0x150   :  { %v1124_v51 = vxor.u32 2147483648, %v3223_v3  ;;  %v483_v13 = vshll.u32 %v3860_v36, %v481_v61  ;;  %v3901_v49 = vmul.u32.u64.low %v3879_v34, %v1178_v48  ;;  %v3902_v14 = vmul.u32.u64.high %v3879_v34, %v1178_v48, %v3901_v49 }
 0x151   :  { %v1128_v24 = vsel %vm1126_vm3, %v1127_v43, %v3223_v3  ;;  %v2508_v23 = vsel %vm2506_vm4, %v1127_v43, %v3223_v3  ;;  %v484_v25 = vshrl.u32 %v466_v22, %v482_v33  ;;  %v487_v30 = vadd.s32 127, %v486_v5 }
 0x152   :  { %v1125_v20 = vsel %vm1123_vm5, %v3221_v57, %v1124_v51  ;;  %v2505_v6 = vsel %vm2503_vm6, %v3221_v57, %v1124_v51  ;;  %v1189_v36 = vadd.s32 1, %v3895_v42  ;;  %v523_v4 = vadd.s32 1, %v2995_v27 }
 0x153   :  { %v1129_v35 = vsel %vm1122_vm9, %v1125_v20, %v1128_v24  ;;  %v2509_v21 = vsel %vm2502_vm10, %v2505_v6, %v2508_v23  ;;  %v485_v55 = vor.u32 %v484_v25, %v483_v13  ;;  %v488_v32 = vshll.u32 %v487_v30, 23 }
 0x154   :  { %v1130_v22 = vsel %vm1120_vm12, nan, %v1129_v35  ;;  %v2510_v17 = vsel %vm1120_vm12, nan, %v2509_v21  ;;  %v497_v59 = vsel %vm412_vm13, %v496_v38, %v3845_v15  ;;  %vm1188_vm0 = vc.u32 %v3902_v14, %v3894_v63 }
 0x155   :  { %v1557_v10 = vmul.f32 %v3677_v19, %v1130_v22  ;;  %v2935_v7 = vmul.f32 %v3677_v19, %v2510_v17  ;;  %v489_v1 = vor.u32 4788187, %v488_v32  ;;  %v1186_v56 = vmul.u32 %v3879_v34, %v1170_v11 }
 0x156   :  { %vm3931_vm1 = vcmp.le.f32.partialorder %v410_v2, 0.7853982  ;;  %v1190_v28 = vsel %vm1188_vm0, %v1189_v36, %v3895_v42  ;;  %v513_v15 = vand.u32 2147483647, %v3411_v52  ;;  %vm524_vm2 = vcmp.gt.s32.totalorder %v523_v4, 0 }
 0x157   :  { %1570 = vst [vmem:[#allocation2 + $0x80] sm:$0xff] %v1557_v10  ;;  %2948 = vst [vmem:[#allocation2 + $0x88] sm:$0xff] %v2935_v7  ;;  %v490_v38 = vand.u32 2147483647, %v489_v1  ;;  %v492_v9 = vcvt.s32.f32 %v485_v55  ;;  %v1191_v53 = vadd.s32 %v1190_v28, %v1186_v56  ;;  %v525_v26 = vsel %vm524_vm2, %v523_v4, 0  ;;  %v3964_v55 = vpop.f32.mrf.mxu0 }
 0x158   :  { %v499_v34 = vsel %vm3931_vm1, 0, %v497_v59  ;;  %v527_v12 = vand.u32 31, %v525_v26  ;;  %v520_v57 = vand.u32 8388607, %v513_v15  ;;  %v526_v13 = vshrl.u32 %v525_v26, 5 }
 0x159   :  { %v493_v44 = vmul.f32 %v492_v9, %v490_v38  ;;  %v1192_v2 = vadd.s32 536870912, %v1191_v53  ;;  %v1876_v45 = vadd.s32 3, %v499_v34  ;;  %v3960_v4 = vand.u32 3, %v499_v34  ;;  %v3124_v1 = vpop.f32.mrf.mxu0 }
 0x15a   :  { %v528_v46 = vsub.s32 32, %v527_v12  ;;  %v530_v61 = vshll.u32 %v3286_v54, %v527_v12  ;;  %v533_v5 = vshll.u32 %v3287_v58, %v527_v12  ;;  %v536_v49 = vshll.u32 %v3288_v60, %v527_v12 }
 0x15b   :  { %v494_v18 = vxor.u32 2147483648, %v493_v44  ;;  %v3939_v27 = vshrl.u32 %v1192_v2, 30  ;;  %v539_v24 = vshll.u32 %v3289_v62, %v527_v12  ;;  %v542_v21 = vshll.u32 %v3290_v0, %v527_v12 }
 0x15c   :  { %v531_v48 = vshrl.u32 %v3287_v58, %v528_v46  ;;  %v534_v42 = vshrl.u32 %v3288_v60, %v528_v46  ;;  %v537_v3 = vshrl.u32 %v3289_v62, %v528_v46  ;;  %v540_v11 = vshrl.u32 %v3290_v0, %v528_v46 }
 0x15d   :  { %v495_v43 = vsel %vm412_vm13, %v494_v18, %v493_v44  ;;  %v1194_v33 = vshll.u32 %v3939_v27, 30  ;;  %v543_v36 = vshrl.u32 %v3291_v8, %v528_v46  ;;  %v3966_v32 = vand.u32 3, %v1876_v45 }
 0x15e   :  { %v498_v51 = vsel %vm3931_vm1, %v3400_v39, %v495_v43  ;;  %v532_v25 = vor.u32 %v531_v48, %v530_v61  ;;  %v535_v30 = vor.u32 %v534_v42, %v533_v5  ;;  %v538_v20 = vor.u32 %v537_v3, %v536_v49 }
 0x15f   :  { %3224 = vcosq.f32 %v498_v51  ;;  %v3957_v23 = vsub.s32 %v1191_v53, %v1194_v33  ;;  %v541_v6 = vor.u32 %v540_v11, %v539_v24  ;;  %v521_v22 = vor.u32 8388608, %v520_v57 }
 0x160   :  { %3226 = vsinq.f32 %v498_v51  ;;  %v529_v17 = vshrl.u32 %v3286_v54, %v528_v46  ;;  %v1237_v59 = vand.u32 2139095040, %v3432_v31  ;;  %v544_v7 = vor.u32 %v543_v36, %v542_v21 }
 0x161   :  { %v1197_v35 = vsub.s32 0, %v3957_v23  ;;  %vm545_vm3 = vcmp.lt.s32.totalorder %v526_v13, 1  ;;  %vm548_vm4 = vcmp.lt.s32.totalorder %v526_v13, 4  ;;  %vm547_vm5 = vcmp.lt.s32.totalorder %v526_v13, 3 }
 0x162   :  { %v550_v56 = vsel %vm548_vm4, %v538_v20, 2102212464  ;;  %v553_v41 = vsel %vm545_vm3, %v532_v25, %v535_v30  ;;  %v554_v28 = vsel %vm548_vm4, %v541_v6, 920167782  ;;  %vm508_vm6 = vcmp.eq.s32.totalorder %v3960_v4, 2 }
 0x163   :  { %v3020_v10 = vmin.u32 %v1197_v35, %v3957_v23  ;;  %v555_v9 = vsel %vm547_vm5, %v538_v20, %v554_v28  ;;  %vm546_vm7 = vcmp.lt.s32.totalorder %v526_v13, 2  ;;  %v549_v53 = vsel %vm545_vm3, %v529_v17, %v532_v25 }
 0x164   :  { %v557_v26 = vsel %vm545_vm3, %v535_v30, %v538_v20  ;;  %v561_v34 = vshll.u32 %v521_v22, 8  ;;  %vm505_vm8 = vcmp.eq.s32.totalorder %v3960_v4, 0  ;;  %v551_v44 = vsel %vm547_vm5, %v535_v30, %v550_v56 }
 0x165   :  { %v1199_v38 = vclz %v3020_v10  ;;  %v556_v2 = vsel %vm546_vm7, %v553_v41, %v555_v9  ;;  %v558_v46 = vsel %vm548_vm4, %v544_v7, 1326507024  ;;  %vm504_vm9 = vcmp.lt.s32.totalorder %v3960_v4, 2 }
 0x166   :  { %vm1878_vm10 = vcmp.lt.s32.totalorder %v3966_v32, 2  ;;  %vm1133_vm11 = vcmp.lt.s32.totalorder %v3402_v40, 0  ;;  %v559_v18 = vsel %vm547_vm5, %v541_v6, %v558_v46  ;;  %v1238_v61 = vshrl.u32 %v1237_v59, 23 }
 0x167   :  { %v3021_v12 = vadd.s32 4294967294, %v1199_v38  ;;  %v3983_v45 = vmul.u32.u64.low %v561_v34, %v556_v2  ;;  %v3984_v57 = vmul.u32.u64.high %v561_v34, %v556_v2, %v3983_v45  ;;  %vm502_vm12 = vweird.f32 %v3400_v39 }
 0x168   :  { %vm1879_vm13 = vcmp.eq.s32.totalorder %v3966_v32, 0  ;;  %vm1882_vm14 = vcmp.eq.s32.totalorder %v3966_v32, 2  ;;  %v560_v48 = vsel %vm546_vm7, %v557_v26, %v559_v18  ;;  %v3023_v33 = vadd.s32 4294967169, %v1238_v61 }
 0x169   :  { %vm3022_vm15 = vcmp.lt.s32.totalorder %v3021_v12, 0  ;;  %v3991_v3 = vmul.u32.u64.low %v561_v34, %v560_v48  ;;  %v3992_v43 = vmul.u32.u64.high %v561_v34, %v560_v48, %v3991_v3  ;;  %v1187_v5 = vadd.s32 %v3894_v63, %v3902_v14 }
 0x16a   :  { %v1202_v42 = vsel %vm3022_vm15, 0, %v3021_v12  ;;  %v552_v49 = vsel %vm546_vm7, %v549_v53, %v551_v44  ;;  %v1217_v25 = vsub.s32 4, %v3939_v27  ;;  %v571_v30 = vadd.s32 1, %v3984_v57 }
 0x16b   :  { %v1203_v11 = vsub.s32 32, %v1202_v42  ;;  %v1207_v51 = vsub.s32 4294967266, %v1202_v42  ;;  %v1234_v20 = vand.u32 2147483647, %v3432_v31  ;;  %v1244_v6 = vadd.s32 1, %v3023_v33 }
 0x16c   :  { %v3225_v24 = vpop.eup %3224  ;;  %v1204_v21 = vshll.u32 %v3957_v23, %v1202_v42  ;;  %v568_v63 = vmul.u32 %v561_v34, %v552_v49  ;;  %vm570_vm0 = vc.u32 %v3992_v43, %v3983_v45  ;;  %v1218_v53 = vsel %vm1133_vm11, %v1217_v25, %v3939_v27 }
 0x16d   :  { %v3227_v36 = vpop.eup %3226  ;;  %v509_v35 = vxor.u32 2147483648, %v3225_v24  ;;  %v1205_v22 = vshrl.u32 %v1187_v5, %v1203_v11  ;;  %v1208_v17 = vadd.s32 127, %v1207_v51  ;;  %vm1245_vm1 = vcmp.gt.s32.totalorder %v1244_v6, 0 }
 0x16e   :  { %v506_v59 = vxor.u32 2147483648, %v3227_v36  ;;  %v572_v56 = vsel %vm570_vm0, %v571_v30, %v3984_v57  ;;  %v1246_v41 = vsel %vm1245_vm1, %v1244_v6, 0  ;;  %vm4027_vm2 = vcmp.le.f32.partialorder %v1131_v47, 0.7853982 }
 0x16f   :  { %v510_v14 = vsel %vm508_vm6, %v509_v35, %v3227_v36  ;;  %v1884_v13 = vsel %vm1882_vm14, %v509_v35, %v3227_v36  ;;  %v1206_v10 = vor.u32 %v1205_v22, %v1204_v21  ;;  %v1209_v7 = vshll.u32 %v1208_v17, 23 }
 0x170   :  { %v507_v1 = vsel %vm505_vm8, %v3225_v24, %v506_v59  ;;  %v1881_v23 = vsel %vm1879_vm13, %v3225_v24, %v506_v59  ;;  %v573_v44 = vadd.s32 %v572_v56, %v568_v63  ;;  %v1248_v32 = vand.u32 31, %v1246_v41 }
 0x171   :  { %v511_v28 = vsel %vm504_vm9, %v507_v1, %v510_v14  ;;  %v1885_v38 = vsel %vm1878_vm10, %v1881_v23, %v1884_v13  ;;  %v1210_v9 = vor.u32 4788187, %v1209_v7  ;;  %v1213_v12 = vcvt.s32.f32 %v1206_v10 }
 0x172   :  { %v512_v26 = vsel %vm502_vm12, nan, %v511_v28  ;;  %v1886_v34 = vsel %vm502_vm12, nan, %v1885_v38  ;;  %v574_v27 = vadd.s32 536870912, %v573_v44  ;;  %v1220_v39 = vsel %vm4027_vm2, 0, %v1218_v53 }
 0x173   :  { %v1551_v2 = vmul.f32 %v3677_v19, %v512_v26  ;;  %v2929_v4 = vmul.f32 %v3677_v19, %v1886_v34  ;;  %v1211_v46 = vand.u32 2147483647, %v1210_v9  ;;  %v1241_v61 = vand.u32 8388607, %v1234_v20 }
 0x174   :  { %v1249_v48 = vsub.s32 32, %v1248_v32  ;;  %v4035_v19 = vshrl.u32 %v574_v27, 30  ;;  %v1251_v42 = vshll.u32 %v3286_v54, %v1248_v32  ;;  %v1254_v47 = vshll.u32 %v3287_v58, %v1248_v32 }
 0x175   :  { %1564 = vst [vmem:[#allocation2 + $0x20] sm:$0xff] %v1551_v2  ;;  %2942 = vst [vmem:[#allocation2 + $0x28] sm:$0xff] %v2929_v4  ;;  %v1214_v57 = vmul.f32 %v1213_v12, %v1211_v46  ;;  %v1257_v3 = vshll.u32 %v3288_v60, %v1248_v32  ;;  %v1260_v51 = vshll.u32 %v3289_v62, %v1248_v32  ;;  %v1247_v36 = vshrl.u32 %v1246_v41, 5 }
 0x176   :  { %v1252_v5 = vshrl.u32 %v3287_v58, %v1249_v48  ;;  %v1255_v11 = vshrl.u32 %v3288_v60, %v1249_v48  ;;  %v576_v49 = vshll.u32 %v4035_v19, 30  ;;  %v1258_v24 = vshrl.u32 %v3289_v62, %v1249_v48 }
 0x177   :  { %v1215_v33 = vxor.u32 2147483648, %v1214_v57  ;;  %v1261_v25 = vshrl.u32 %v3290_v0, %v1249_v48  ;;  %v1263_v30 = vshll.u32 %v3290_v0, %v1248_v32  ;;  %v1250_v35 = vshrl.u32 %v3286_v54, %v1249_v48 }
 0x178   :  { %v1264_v21 = vshrl.u32 %v3291_v8, %v1249_v48  ;;  %v4054_v17 = vsub.s32 %v573_v44, %v576_v49  ;;  %v1253_v59 = vor.u32 %v1252_v5, %v1251_v42  ;;  %v1256_v63 = vor.u32 %v1255_v11, %v1254_v47 }
 0x179   :  { %v1216_v6 = vsel %vm1133_vm11, %v1215_v33, %v1214_v57  ;;  %v1259_v14 = vor.u32 %v1258_v24, %v1257_v3  ;;  %v1262_v13 = vor.u32 %v1261_v25, %v1260_v51  ;;  %v619_v10 = vand.u32 2139095040, %v3528_v29 }
 0x17a   :  { %v1219_v22 = vsel %vm4027_vm2, %v3402_v40, %v1216_v6  ;;  %v4057_v7 = vand.u32 3, %v1220_v39  ;;  %v579_v1 = vsub.s32 0, %v4054_v17  ;;  %v1265_v23 = vor.u32 %v1264_v21, %v1263_v30 }
 0x17b   :  { %3228 = vcosq.f32 %v1219_v22  ;;  %v2604_v56 = vadd.s32 3, %v1220_v39  ;;  %v1242_v41 = vor.u32 8388608, %v1241_v61  ;;  %vm1266_vm3 = vcmp.lt.s32.totalorder %v1247_v36, 1 }
 0x17c   :  { %3230 = vsinq.f32 %v1219_v22  ;;  %vm1268_vm4 = vcmp.lt.s32.totalorder %v1247_v36, 3  ;;  %v2996_v28 = vmin.u32 %v579_v1, %v4054_v17  ;;  %vm1269_vm5 = vcmp.lt.s32.totalorder %v1247_v36, 4 }
 0x17d   :  { %v1270_v38 = vsel %vm1266_vm3, %v1250_v35, %v1253_v59  ;;  %v1274_v9 = vsel %vm1266_vm3, %v1253_v59, %v1256_v63  ;;  %v1271_v53 = vsel %vm1269_vm5, %v1259_v14, 2102212464  ;;  %v1275_v26 = vsel %vm1269_vm5, %v1262_v13, 920167782 }
 0x17e   :  { %v1278_v34 = vsel %vm1266_vm3, %v1256_v63, %v1259_v14  ;;  %v620_v12 = vshrl.u32 %v619_v10, 23  ;;  %v581_v44 = vclz %v2996_v28  ;;  %v1272_v2 = vsel %vm1268_vm4, %v1256_v63, %v1271_v53 }
 0x17f   :  { %v1276_v4 = vsel %vm1268_vm4, %v1259_v14, %v1275_v26  ;;  %v1279_v46 = vsel %vm1269_vm5, %v1265_v23, 1326507024  ;;  %v2605_v32 = vand.u32 3, %v2604_v56  ;;  %vm1267_vm6 = vcmp.lt.s32.totalorder %v1247_v36, 2 }
 0x180   :  { %v1282_v18 = vshll.u32 %v1242_v41, 8  ;;  %vm515_vm7 = vcmp.lt.s32.totalorder %v3411_v52, 0  ;;  %v2997_v27 = vadd.s32 4294967294, %v581_v44  ;;  %v1277_v57 = vsel %vm1267_vm6, %v1274_v9, %v1276_v4 }
 0x181   :  { %v1280_v39 = vsel %vm1268_vm4, %v1262_v13, %v1279_v46  ;;  %vm1226_vm8 = vcmp.eq.s32.totalorder %v4057_v7, 0  ;;  %vm4068_vm9 = vcmp.le.f32.partialorder %v513_v15, 0.7853982  ;;  %v1273_v48 = vsel %vm1267_vm6, %v1270_v38, %v1272_v2 }
 0x182   :  { %v1281_v42 = vsel %vm1267_vm6, %v1278_v34, %v1280_v39  ;;  %v4072_v47 = vmul.u32.u64.low %v1282_v18, %v1277_v57  ;;  %v4073_v3 = vmul.u32.u64.high %v1282_v18, %v1277_v57, %v4072_v47  ;;  %vm1225_vm10 = vcmp.lt.s32.totalorder %v4057_v7, 2 }
 0x183   :  { %vm2998_vm11 = vcmp.lt.s32.totalorder %v2997_v27, 0  ;;  %v4077_v33 = vmul.u32.u64.low %v1282_v18, %v1281_v42  ;;  %v4078_v5 = vmul.u32.u64.high %v1282_v18, %v1281_v42, %v4077_v33  ;;  %v2999_v11 = vadd.s32 4294967169, %v620_v12 }
 0x184   :  { %vm1223_vm12 = vweird.f32 %v3402_v40  ;;  %vm1229_vm13 = vcmp.eq.s32.totalorder %v4057_v7, 2  ;;  %vm2606_vm14 = vcmp.lt.s32.totalorder %v2605_v32, 2  ;;  %v584_v15 = vsel %vm2998_vm11, 0, %v2997_v27  ;;  %v4112_v27 = vld [vmem:[%s4544_s2] ss:$0 sm:$0xff] }
 0x185   :  { %v599_v51 = vsub.s32 4, %v4035_v19  ;;  %v569_v49 = vadd.s32 %v3983_v45, %v3992_v43  ;;  %v585_v24 = vsub.s32 32, %v584_v15  ;;  %v589_v25 = vsub.s32 4294967266, %v584_v15 }
 0x186   :  { %v626_v30 = vadd.s32 1, %v2999_v11  ;;  %vm2607_vm15 = vcmp.eq.s32.totalorder %v2605_v32, 0  ;;  %vm2610_vm0 = vcmp.eq.s32.totalorder %v2605_v32, 2  ;;  %v1289_v6 = vmul.u32 %v1282_v18, %v1273_v48 }
 0x187   :  { %v1292_v36 = vadd.s32 1, %v4073_v3  ;;  %v586_v21 = vshll.u32 %v4054_v17, %v584_v15  ;;  %v587_v22 = vshrl.u32 %v569_v49, %v585_v24  ;;  %v590_v59 = vadd.s32 127, %v589_v25 }
 0x188   :  { %v3229_v35 = vpop.eup %3228  ;;  %vm1291_vm1 = vc.u32 %v4078_v5, %v4072_v47  ;;  %v600_v45 = vsel %vm515_vm7, %v599_v51, %v4035_v19  ;;  %vm627_vm2 = vcmp.gt.s32.totalorder %v626_v30, 0  ;;  %v616_v41 = vand.u32 2147483647, %v3528_v29 }
 0x189   :  { %v3231_v63 = vpop.eup %3230  ;;  %v1230_v14 = vxor.u32 2147483648, %v3229_v35  ;;  %v1293_v43 = vsel %vm1291_vm1, %v1292_v36, %v4073_v3  ;;  %v588_v10 = vor.u32 %v587_v22, %v586_v21  ;;  %v591_v1 = vshll.u32 %v590_v59, 23 }
 0x18a   :  { %v1227_v13 = vxor.u32 2147483648, %v3231_v63  ;;  %v1294_v23 = vadd.s32 %v1293_v43, %v1289_v6  ;;  %v628_v28 = vsel %vm627_vm2, %v626_v30, 0  ;;  %v602_v53 = vsel %vm4068_vm9, 0, %v600_v45 }
 0x18b   :  { %v1231_v17 = vsel %vm1229_vm13, %v1230_v14, %v3231_v63  ;;  %v2612_v56 = vsel %vm2610_vm0, %v1230_v14, %v3231_v63  ;;  %v592_v9 = vor.u32 4788187, %v591_v1  ;;  %v595_v12 = vcvt.s32.f32 %v588_v10 }
 0x18c   :  { %v1228_v38 = vsel %vm1226_vm8, %v3229_v35, %v1227_v13  ;;  %v2609_v19 = vsel %vm2607_vm15, %v3229_v35, %v1227_v13  ;;  %v1295_v44 = vadd.s32 536870912, %v1294_v23  ;;  %v630_v18 = vand.u32 31, %v628_v28 }
 0x18d   :  { %v1232_v26 = vsel %vm1225_vm10, %v1228_v38, %v1231_v17  ;;  %v2613_v34 = vsel %vm2606_vm14, %v2609_v19, %v2612_v56  ;;  %v593_v46 = vand.u32 2147483647, %v592_v9  ;;  %v623_v39 = vand.u32 8388607, %v616_v41 }
 0x18e   :  { %v1233_v2 = vsel %vm1223_vm12, nan, %v1232_v26  ;;  %v2614_v4 = vsel %vm1223_vm12, nan, %v2613_v34  ;;  %v4116_v57 = vshrl.u32 %v1295_v44, 30  ;;  %v631_v42 = vsub.s32 32, %v630_v18 }
 0x18f   :  { %v1558_v7 = vmul.f32 %v4112_v27, %v1233_v2  ;;  %v2936_v32 = vmul.f32 %v4112_v27, %v2614_v4  ;;  %v596_v48 = vmul.f32 %v595_v12, %v593_v46  ;;  %v1980_v33 = vadd.s32 3, %v602_v53 }
 0x190   :  { %v1297_v40 = vshll.u32 %v4116_v57, 30  ;;  %v634_v11 = vshrl.u32 %v3287_v58, %v631_v42  ;;  %v637_v15 = vshrl.u32 %v3288_v60, %v631_v42  ;;  %v624_v49 = vor.u32 8388608, %v623_v39 }
 0x191   :  { %1571 = vst [vmem:[#allocation2 + $0x90] sm:$0xff] %v1558_v7  ;;  %2949 = vst [vmem:[#allocation2 + $0x98] sm:$0xff] %v2936_v32  ;;  %v597_v3 = vxor.u32 2147483648, %v596_v48  ;;  %v640_v24 = vshrl.u32 %v3289_v62, %v631_v42  ;;  %v643_v25 = vshrl.u32 %v3290_v0, %v631_v42  ;;  %v629_v6 = vshrl.u32 %v628_v28, 5 }
 0x192   :  { %v4123_v51 = vsub.s32 %v1294_v23, %v1297_v40  ;;  %v633_v36 = vshll.u32 %v3286_v54, %v630_v18  ;;  %v636_v35 = vshll.u32 %v3287_v58, %v630_v18  ;;  %v639_v59 = vshll.u32 %v3288_v60, %v630_v18 }
 0x193   :  { %v598_v30 = vsel %vm515_vm7, %v597_v3, %v596_v48  ;;  %v642_v63 = vshll.u32 %v3289_v62, %v630_v18  ;;  %v4137_v14 = vand.u32 3, %v602_v53  ;;  %v4140_v23 = vand.u32 3, %v1980_v33 }
 0x194   :  { %v601_v21 = vsel %vm4068_vm9, %v3411_v52, %v598_v30  ;;  %v1300_v22 = vsub.s32 0, %v4123_v51  ;;  %v635_v45 = vor.u32 %v634_v11, %v633_v36  ;;  %v638_v43 = vor.u32 %v637_v15, %v636_v35 }
 0x195   :  { %3232 = vcosq.f32 %v601_v21  ;;  %v641_v10 = vor.u32 %v640_v24, %v639_v59  ;;  %v644_v1 = vor.u32 %v643_v25, %v642_v63  ;;  %v645_v61 = vshll.u32 %v3290_v0, %v630_v18 }
 0x196   :  { %3234 = vsinq.f32 %v601_v21  ;;  %v3024_v13 = vmin.u32 %v1300_v22, %v4123_v51  ;;  %v646_v17 = vshrl.u32 %v3291_v8, %v631_v42  ;;  %v664_v56 = vshll.u32 %v624_v49, 8 }
 0x197   :  { %v632_v38 = vshrl.u32 %v3286_v54, %v631_v42  ;;  %vm648_vm3 = vcmp.lt.s32.totalorder %v629_v6, 1  ;;  %v1340_v19 = vand.u32 2139095040, %v3624_v37  ;;  %vm649_vm4 = vcmp.lt.s32.totalorder %v629_v6, 2 }
 0x198   :  { %v1302_v28 = vclz %v3024_v13  ;;  %v647_v9 = vor.u32 %v646_v17, %v645_v61  ;;  %vm650_vm5 = vcmp.lt.s32.totalorder %v629_v6, 3  ;;  %vm651_vm6 = vcmp.lt.s32.totalorder %v629_v6, 4 }
 0x199   :  { %v653_v26 = vsel %vm651_vm6, %v641_v10, 2102212464  ;;  %v656_v34 = vsel %vm648_vm3, %v635_v45, %v638_v43  ;;  %v657_v12 = vsel %vm651_vm6, %v644_v1, 920167782  ;;  %v652_v44 = vsel %vm648_vm3, %v632_v38, %v635_v45 }
 0x19a   :  { %v3025_v53 = vadd.s32 4294967294, %v1302_v28  ;;  %v658_v2 = vsel %vm650_vm5, %v641_v10, %v657_v12  ;;  %v660_v4 = vsel %vm648_vm3, %v638_v43, %v641_v10  ;;  %v661_v46 = vsel %vm651_vm6, %v647_v9, 1326507024 }
 0x19b   :  { %v654_v18 = vsel %vm650_vm5, %v638_v43, %v653_v26  ;;  %v659_v7 = vsel %vm649_vm4, %v656_v34, %v658_v2  ;;  %v662_v32 = vsel %vm650_vm5, %v644_v1, %v661_v46  ;;  %vm607_vm8 = vcmp.lt.s32.totalorder %v4137_v14, 2 }
 0x19c   :  { %vm3026_vm7 = vcmp.lt.s32.totalorder %v3025_v53, 0  ;;  %v663_v48 = vsel %vm649_vm4, %v660_v4, %v662_v32  ;;  %v4148_v42 = vmul.u32.u64.low %v664_v56, %v659_v7  ;;  %v4149_v40 = vmul.u32.u64.high %v664_v56, %v659_v7, %v4148_v42 }
 0x19d   :  { %v1305_v39 = vsel %vm3026_vm7, 0, %v3025_v53  ;;  %vm608_vm9 = vcmp.eq.s32.totalorder %v4137_v14, 0  ;;  %vm1236_vm10 = vcmp.lt.s32.totalorder %v3432_v31, 0  ;;  %v1290_v3 = vadd.s32 %v4072_v47, %v4078_v5 }
 0x19e   :  { %v1306_v33 = vsub.s32 32, %v1305_v39  ;;  %v1310_v11 = vsub.s32 4294967266, %v1305_v39  ;;  %vm605_vm11 = vweird.f32 %v3411_v52  ;;  %vm611_vm12 = vcmp.eq.s32.totalorder %v4137_v14, 2 }
 0x19f   :  { %v4159_v15 = vmul.u32.u64.low %v664_v56, %v663_v48  ;;  %v4160_v49 = vmul.u32.u64.high %v664_v56, %v663_v48, %v4159_v15  ;;  %v1341_v24 = vshrl.u32 %v1340_v19, 23  ;;  %v1307_v25 = vshll.u32 %v4123_v51, %v1305_v39 }
 0x1a0   :  { %v1308_v30 = vshrl.u32 %v1290_v3, %v1306_v33  ;;  %v1311_v36 = vadd.s32 127, %v1310_v11  ;;  %v655_v35 = vsel %vm649_vm4, %v652_v44, %v654_v18  ;;  %vm1982_vm13 = vcmp.lt.s32.totalorder %v4140_v23, 2 }
 0x1a1   :  { %vm1983_vm14 = vcmp.eq.s32.totalorder %v4140_v23, 0  ;;  %v674_v47 = vadd.s32 1, %v4149_v40  ;;  %v3027_v5 = vadd.s32 4294967169, %v1341_v24  ;;  %vm1986_vm15 = vcmp.eq.s32.totalorder %v4140_v23, 2 }
 0x1a2   :  { %v3233_v21 = vpop.eup %3232  ;;  %v1309_v22 = vor.u32 %v1308_v30, %v1307_v25  ;;  %v1312_v59 = vshll.u32 %v1311_v36, 23  ;;  %v1320_v63 = vsub.s32 4, %v4116_v57  ;;  %v671_v43 = vmul.u32 %v664_v56, %v655_v35 }
 0x1a3   :  { %v3235_v45 = vpop.eup %3234  ;;  %v612_v51 = vxor.u32 2147483648, %v3233_v21  ;;  %vm673_vm0 = vc.u32 %v4160_v49, %v4148_v42  ;;  %v1347_v6 = vadd.s32 1, %v3027_v5  ;;  %vm1235_vm2 = vcmp.le.f32.partialorder %v1234_v20, 0.7853982 }
 0x1a4   :  { %v609_v13 = vxor.u32 2147483648, %v3235_v45  ;;  %v1313_v10 = vor.u32 4788187, %v1312_v59  ;;  %v1316_v1 = vcvt.s32.f32 %v1309_v22  ;;  %v675_v61 = vsel %vm673_vm0, %v674_v47, %v4149_v40 }
 0x1a5   :  { %v613_v17 = vsel %vm611_vm12, %v612_v51, %v3235_v45  ;;  %v1988_v28 = vsel %vm1986_vm15, %v612_v51, %v3235_v45  ;;  %v676_v38 = vadd.s32 %v675_v61, %v671_v43  ;;  %vm1348_vm1 = vcmp.gt.s32.totalorder %v1347_v6, 0 }
 0x1a6   :  { %v610_v19 = vsel %vm608_vm9, %v3233_v21, %v609_v13  ;;  %v1985_v56 = vsel %vm1983_vm14, %v3233_v21, %v609_v13  ;;  %v1314_v9 = vand.u32 2147483647, %v1313_v10  ;;  %v1349_v53 = vsel %vm1348_vm1, %v1347_v6, 0 }
 0x1a7   :  { %v614_v26 = vsel %vm607_vm8, %v610_v19, %v613_v17  ;;  %v1989_v34 = vsel %vm1982_vm13, %v1985_v56, %v1988_v28  ;;  %v1321_v12 = vsel %vm1236_vm10, %v1320_v63, %v4116_v57  ;;  %v677_v44 = vadd.s32 536870912, %v676_v38 }
 0x1a8   :  { %v615_v2 = vsel %vm605_vm11, nan, %v614_v26  ;;  %v1990_v4 = vsel %vm605_vm11, nan, %v1989_v34  ;;  %v1317_v46 = vmul.f32 %v1316_v1, %v1314_v9  ;;  %v1351_v18 = vand.u32 31, %v1349_v53 }
 0x1a9   :  { %v1552_v7 = vmul.f32 %v4112_v27, %v615_v2  ;;  %v2930_v14 = vmul.f32 %v4112_v27, %v1990_v4  ;;  %v4191_v32 = vshrl.u32 %v677_v44, 30  ;;  %v1337_v57 = vand.u32 2147483647, %v3624_v37 }
 0x1aa   :  { %v1318_v23 = vxor.u32 2147483648, %v1317_v46  ;;  %v1352_v39 = vsub.s32 32, %v1351_v18  ;;  %v1323_v48 = vsel %vm1235_vm2, 0, %v1321_v12  ;;  %v1354_v40 = vshll.u32 %v3286_v54, %v1351_v18 }
 0x1ab   :  { %1565 = vst [vmem:[#allocation2 + $0x30] sm:$0xff] %v1552_v7  ;;  %2943 = vst [vmem:[#allocation2 + $0x38] sm:$0xff] %v2930_v14  ;;  %v679_v52 = vshll.u32 %v4191_v32, 30  ;;  %v1357_v11 = vshll.u32 %v3287_v58, %v1351_v18  ;;  %v1360_v20 = vshll.u32 %v3288_v60, %v1351_v18  ;;  %v2708_v36 = vadd.s32 3, %v1323_v48 }
 0x1ac   :  { %v1319_v3 = vsel %vm1236_vm10, %v1318_v23, %v1317_v46  ;;  %v1355_v33 = vshrl.u32 %v3287_v58, %v1352_v39  ;;  %v1358_v25 = vshrl.u32 %v3288_v60, %v1352_v39  ;;  %v1361_v30 = vshrl.u32 %v3289_v62, %v1352_v39 }
 0x1ad   :  { %v1322_v15 = vsel %vm1235_vm2, %v3432_v31, %v1319_v3  ;;  %v4204_v24 = vsub.s32 %v676_v38, %v679_v52  ;;  %v1344_v35 = vand.u32 8388607, %v1337_v57  ;;  %v1363_v47 = vshll.u32 %v3289_v62, %v1351_v18 }
 0x1ae   :  { %3236 = vcosq.f32 %v1322_v15  ;;  %v4211_v5 = vand.u32 3, %v1323_v48  ;;  %v1350_v22 = vshrl.u32 %v1349_v53, 5  ;;  %vm618_vm3 = vcmp.lt.s32.totalorder %v3528_v29, 0 }
 0x1af   :  { %3238 = vsinq.f32 %v1322_v15  ;;  %v682_v21 = vsub.s32 0, %v4204_v24  ;;  %v1362_v59 = vor.u32 %v1361_v30, %v1360_v20  ;;  %v1364_v63 = vshrl.u32 %v3290_v0, %v1352_v39 }
 0x1b0   :  { %v1366_v45 = vshll.u32 %v3290_v0, %v1351_v18  ;;  %v1367_v51 = vshrl.u32 %v3291_v8, %v1352_v39  ;;  %v1353_v6 = vshrl.u32 %v3286_v54, %v1352_v39  ;;  %v1356_v13 = vor.u32 %v1355_v33, %v1354_v40 }
 0x1b1   :  { %v3000_v43 = vmin.u32 %v682_v21, %v4204_v24  ;;  %v1359_v10 = vor.u32 %v1358_v25, %v1357_v11  ;;  %v4220_v1 = vand.u32 3, %v2708_v36  ;;  %v1345_v61 = vor.u32 8388608, %v1344_v35 }
 0x1b2   :  { %v1365_v17 = vor.u32 %v1364_v63, %v1363_v47  ;;  %v1368_v28 = vor.u32 %v1367_v51, %v1366_v45  ;;  %vm4224_vm4 = vcmp.le.f32.partialorder %v616_v41, 0.7853982  ;;  %vm1369_vm5 = vcmp.lt.s32.totalorder %v1350_v22, 1 }
 0x1b3   :  { %v684_v19 = vclz %v3000_v43  ;;  %vm1372_vm6 = vcmp.lt.s32.totalorder %v1350_v22, 4  ;;  %v722_v56 = vand.u32 2139095040, %v3785_v16  ;;  %v702_v9 = vsub.s32 4, %v4191_v32 }
 0x1b4   :  { %vm1370_vm7 = vcmp.lt.s32.totalorder %v1350_v22, 2  ;;  %vm1371_vm8 = vcmp.lt.s32.totalorder %v1350_v22, 3  ;;  %v1374_v53 = vsel %vm1372_vm6, %v1362_v59, 2102212464  ;;  %vm1332_vm9 = vcmp.eq.s32.totalorder %v4211_v5, 2 }
 0x1b5   :  { %v3001_v26 = vadd.s32 4294967294, %v684_v19  ;;  %v1373_v34 = vsel %vm1369_vm5, %v1353_v6, %v1356_v13  ;;  %v1377_v41 = vsel %vm1369_vm5, %v1356_v13, %v1359_v10  ;;  %v1378_v12 = vsel %vm1372_vm6, %v1365_v17, 920167782 }
 0x1b6   :  { %vm1329_vm10 = vcmp.eq.s32.totalorder %v4211_v5, 0  ;;  %vm2711_vm11 = vcmp.eq.s32.totalorder %v4220_v1, 0  ;;  %v1375_v44 = vsel %vm1371_vm8, %v1359_v10, %v1374_v53  ;;  %v1379_v2 = vsel %vm1371_vm8, %v1362_v59, %v1378_v12 }
 0x1b7   :  { %v1381_v4 = vsel %vm1369_vm5, %v1359_v10, %v1362_v59  ;;  %v1382_v46 = vsel %vm1372_vm6, %v1368_v28, 1326507024  ;;  %vm1328_vm12 = vcmp.lt.s32.totalorder %v4211_v5, 2  ;;  %vm2710_vm13 = vcmp.lt.s32.totalorder %v4220_v1, 2 }
 0x1b8   :  { %v672_v18 = vadd.s32 %v4148_v42, %v4160_v49  ;;  %vm3002_vm14 = vcmp.lt.s32.totalorder %v3001_v26, 0  ;;  %v1380_v7 = vsel %vm1370_vm7, %v1377_v41, %v1379_v2  ;;  %v1383_v14 = vsel %vm1371_vm8, %v1365_v17, %v1382_v46 }
 0x1b9   :  { %vm1326_vm15 = vweird.f32 %v3432_v31  ;;  %v687_v23 = vsel %vm3002_vm14, 0, %v3001_v26  ;;  %v1384_v39 = vsel %vm1370_vm7, %v1381_v4, %v1383_v14  ;;  %v1385_v48 = vshll.u32 %v1345_v61, 8 }
 0x1ba   :  { %v723_v52 = vshrl.u32 %v722_v56, 23  ;;  %v688_v40 = vsub.s32 32, %v687_v23  ;;  %v692_v3 = vsub.s32 4294967266, %v687_v23  ;;  %v703_v33 = vsel %vm618_vm3, %v702_v9, %v4191_v32 }
 0x1bb   :  { %v1376_v42 = vsel %vm1370_vm7, %v1373_v34, %v1375_v44  ;;  %v4253_v49 = vmul.u32.u64.low %v1385_v48, %v1384_v39  ;;  %v4254_v11 = vmul.u32.u64.high %v1385_v48, %v1384_v39, %v4253_v49  ;;  %v3237_v25 = vpop.eup %3236  ;;  %v689_v30 = vshll.u32 %v4204_v24, %v687_v23 }
 0x1bc   :  { %v4256_v20 = vmul.u32.u64.low %v1385_v48, %v1380_v7  ;;  %v4257_v15 = vmul.u32.u64.high %v1385_v48, %v1380_v7, %v4256_v20  ;;  %v690_v36 = vshrl.u32 %v672_v18, %v688_v40  ;;  %v693_v35 = vadd.s32 127, %v692_v3  ;;  %v3239_v21 = vpop.eup %3238 }
 0x1bd   :  { %v3003_v47 = vadd.s32 4294967169, %v723_v52  ;;  %v1333_v59 = vxor.u32 2147483648, %v3237_v25  ;;  %vm2714_vm0 = vcmp.eq.s32.totalorder %v4220_v1, 2  ;;  %v4264_v32 = vsel %vm4224_vm4, 0, %v703_v33 }
 0x1be   :  { %v719_v22 = vand.u32 2147483647, %v3785_v16  ;;  %v1330_v63 = vxor.u32 2147483648, %v3239_v21  ;;  %v691_v45 = vor.u32 %v690_v36, %v689_v30  ;;  %v694_v51 = vshll.u32 %v693_v35, 23 }
 0x1bf   :  { %v729_v43 = vadd.s32 1, %v3003_v47  ;;  %v1334_v24 = vsel %vm1332_vm9, %v1333_v59, %v3239_v21  ;;  %v2716_v6 = vsel %vm2714_vm0, %v1333_v59, %v3239_v21  ;;  %v1392_v13 = vmul.u32 %v1385_v48, %v1376_v42 }
 0x1c0   :  { %vm1394_vm1 = vc.u32 %v4254_v11, %v4256_v20  ;;  %v1331_v10 = vsel %vm1329_vm10, %v3237_v25, %v1330_v63  ;;  %v2713_v61 = vsel %vm2711_vm11, %v3237_v25, %v1330_v63  ;;  %v695_v17 = vor.u32 4788187, %v694_v51 }
 0x1c1   :  { %v698_v28 = vcvt.s32.f32 %v691_v45  ;;  %v1335_v19 = vsel %vm1328_vm12, %v1331_v10, %v1334_v24  ;;  %v2717_v56 = vsel %vm2710_vm13, %v2713_v61, %v2716_v6  ;;  %v1395_v9 = vadd.s32 1, %v4257_v15 }
 0x1c2   :  { %vm730_vm2 = vcmp.gt.s32.totalorder %v729_v43, 0  ;;  %v1336_v53 = vsel %vm1326_vm15, nan, %v1335_v19  ;;  %v2718_v26 = vsel %vm1326_vm15, nan, %v2717_v56  ;;  %v696_v34 = vand.u32 2147483647, %v695_v17 }
 0x1c3   :  { %v731_v41 = vsel %vm730_vm2, %v729_v43, 0  ;;  %v1559_v12 = vmul.f32 %v4112_v27, %v1336_v53  ;;  %v2937_v44 = vmul.f32 %v4112_v27, %v2718_v26  ;;  %v1396_v5 = vsel %vm1394_vm1, %v1395_v9, %v4257_v15 }
 0x1c4   :  { %v699_v2 = vmul.f32 %v698_v28, %v696_v34  ;;  %v1397_v1 = vadd.s32 %v1396_v5, %v1392_v13  ;;  %v733_v4 = vand.u32 31, %v731_v41  ;;  %v2084_v46 = vadd.s32 3, %v4264_v32 }
 0x1c5   :  { %1572 = vst [vmem:[#allocation2 + $0xa0] sm:$0xff] %v1559_v12  ;;  %2950 = vst [vmem:[#allocation2 + $0xa8] sm:$0xff] %v2937_v44  ;;  %v726_v31 = vand.u32 8388607, %v719_v22  ;;  %v732_v23 = vshrl.u32 %v731_v41, 5  ;;  %v709_v61 = vand.u32 3, %v4264_v32  ;;  %vm708_vm8 = vweird.f32 %v3528_v29 }
 0x1c6   :  { %v700_v18 = vxor.u32 2147483648, %v699_v2  ;;  %v1398_v7 = vadd.s32 536870912, %v1397_v1  ;;  %v734_v14 = vsub.s32 32, %v733_v4  ;;  %v736_v39 = vshll.u32 %v3286_v54, %v733_v4 }
 0x1c7   :  { %v739_v48 = vshll.u32 %v3287_v58, %v733_v4  ;;  %v742_v52 = vshll.u32 %v3288_v60, %v733_v4  ;;  %v745_v42 = vshll.u32 %v3289_v62, %v733_v4  ;;  %v727_v35 = vor.u32 8388608, %v726_v31 }
 0x1c8   :  { %v701_v40 = vsel %vm618_vm3, %v700_v18, %v699_v2  ;;  %v4295_v3 = vshrl.u32 %v1398_v7, 30  ;;  %v737_v33 = vshrl.u32 %v3287_v58, %v734_v14  ;;  %v740_v15 = vshrl.u32 %v3288_v60, %v734_v14 }
 0x1c9   :  { %v704_v49 = vsel %vm4224_vm4, %v3528_v29, %v701_v40  ;;  %v743_v25 = vshrl.u32 %v3289_v62, %v734_v14  ;;  %v746_v30 = vshrl.u32 %v3290_v0, %v734_v14  ;;  %v748_v38 = vshll.u32 %v3290_v0, %v733_v4 }
 0x1ca   :  { %3240 = vcosq.f32 %v704_v49  ;;  %v1400_v36 = vshll.u32 %v4295_v3, 30  ;;  %v738_v47 = vor.u32 %v737_v33, %v736_v39  ;;  %v741_v21 = vor.u32 %v740_v15, %v739_v48 }
 0x1cb   :  { %3242 = vsinq.f32 %v704_v49  ;;  %v744_v59 = vor.u32 %v743_v25, %v742_v52  ;;  %v747_v63 = vor.u32 %v746_v30, %v745_v42  ;;  %v749_v51 = vshrl.u32 %v3291_v8, %v734_v14 }
 0x1cc   :  { %v4306_v45 = vsub.s32 %v1397_v1, %v1400_v36  ;;  %vm754_vm3 = vcmp.lt.s32.totalorder %v732_v23, 4  ;;  %vm751_vm4 = vcmp.lt.s32.totalorder %v732_v23, 1  ;;  %vm753_vm5 = vcmp.lt.s32.totalorder %v732_v23, 3 }
 0x1cd   :  { %v760_v43 = vsel %vm754_vm3, %v747_v63, 920167782  ;;  %v750_v6 = vor.u32 %v749_v51, %v748_v38  ;;  %v756_v13 = vsel %vm754_vm3, %v744_v59, 2102212464  ;;  %v759_v10 = vsel %vm751_vm4, %v738_v47, %v741_v21 }
 0x1ce   :  { %v1403_v24 = vsub.s32 0, %v4306_v45  ;;  %v2085_v17 = vand.u32 3, %v2084_v46  ;;  %v735_v28 = vshrl.u32 %v3286_v54, %v734_v14  ;;  %v761_v19 = vsel %vm753_vm5, %v744_v59, %v760_v43 }
 0x1cf   :  { %vm752_vm6 = vcmp.lt.s32.totalorder %v732_v23, 2  ;;  %v763_v9 = vsel %vm751_vm4, %v741_v21, %v744_v59  ;;  %v767_v53 = vshll.u32 %v727_v35, 8  ;;  %v757_v34 = vsel %vm753_vm5, %v741_v21, %v756_v13 }
 0x1d0   :  { %v3028_v56 = vmin.u32 %v1403_v24, %v4306_v45  ;;  %v755_v26 = vsel %vm751_vm4, %v735_v28, %v738_v47  ;;  %v762_v41 = vsel %vm752_vm6, %v759_v10, %v761_v19  ;;  %v764_v12 = vsel %vm754_vm3, %v750_v6, 1326507024 }
 0x1d1   :  { %v765_v32 = vsel %vm753_vm5, %v747_v63, %v764_v12  ;;  %v4321_v5 = vmul.u32.u64.low %v767_v53, %v762_v41  ;;  %v4322_v2 = vmul.u32.u64.high %v767_v53, %v762_v41, %v4321_v5  ;;  %vm710_vm7 = vcmp.lt.s32.totalorder %v709_v61, 2 }
 0x1d2   :  { %v1405_v44 = vclz %v3028_v56  ;;  %v766_v1 = vsel %vm752_vm6, %v763_v9, %v765_v32  ;;  %vm711_vm9 = vcmp.eq.s32.totalorder %v709_v61, 0  ;;  %vm714_vm10 = vcmp.eq.s32.totalorder %v709_v61, 2 }
 0x1d3   :  { %v4327_v46 = vmul.u32.u64.low %v767_v53, %v766_v1  ;;  %v4328_v18 = vmul.u32.u64.high %v767_v53, %v766_v1, %v4327_v46  ;;  %vm2086_vm11 = vcmp.lt.s32.totalorder %v2085_v17, 2  ;;  %v758_v7 = vsel %vm752_vm6, %v755_v26, %v757_v34 }
 0x1d4   :  { %v3029_v4 = vadd.s32 4294967294, %v1405_v44  ;;  %v1443_v31 = vand.u32 2139095040, %v3855_v50  ;;  %vm2087_vm12 = vcmp.eq.s32.totalorder %v2085_v17, 0  ;;  %vm2090_vm13 = vcmp.eq.s32.totalorder %v2085_v17, 2 }
 0x1d5   :  { %v1393_v14 = vadd.s32 %v4256_v20, %v4254_v11  ;;  %v1423_v52 = vsub.s32 4, %v4295_v3  ;;  %v777_v40 = vadd.s32 1, %v4322_v2  ;;  %v774_v25 = vmul.u32 %v767_v53, %v758_v7 }
 0x1d6   :  { %vm3030_vm14 = vcmp.lt.s32.totalorder %v3029_v4, 0  ;;  %v1444_v33 = vshrl.u32 %v1443_v31, 23  ;;  %vm776_vm15 = vc.u32 %v4328_v18, %v4321_v5  ;;  %vm1339_vm1 = vcmp.lt.s32.totalorder %v3624_v37, 0 }
 0x1d7   :  { %v3241_v39 = vpop.eup %3240  ;;  %v1408_v48 = vsel %vm3030_vm14, 0, %v3029_v4  ;;  %v778_v38 = vsel %vm776_vm15, %v777_v40, %v4322_v2  ;;  %v1440_v17 = vand.u32 2147483647, %v3855_v50  ;;  %v1424_v29 = vsel %vm1339_vm1, %v1423_v52, %v4295_v3 }
 0x1d8   :  { %v3243_v42 = vpop.eup %3242  ;;  %v715_v49 = vxor.u32 2147483648, %v3241_v39  ;;  %v1409_v15 = vsub.s32 32, %v1408_v48  ;;  %v1413_v23 = vsub.s32 4294967266, %v1408_v48  ;;  %v1410_v36 = vshll.u32 %v4306_v45, %v1408_v48 }
 0x1d9   :  { %v712_v30 = vxor.u32 2147483648, %v3243_v42  ;;  %v3031_v11 = vadd.s32 4294967169, %v1444_v33  ;;  %v779_v28 = vadd.s32 %v778_v38, %v774_v25  ;;  %vm4361_vm2 = vcmp.le.f32.partialorder %v1337_v57, 0.7853982 }
 0x1da   :  { %v716_v20 = vsel %vm714_vm10, %v715_v49, %v3243_v42  ;;  %v2092_v35 = vsel %vm2090_vm13, %v715_v49, %v3243_v42  ;;  %v1411_v47 = vshrl.u32 %v1393_v14, %v1409_v15  ;;  %v1414_v21 = vadd.s32 127, %v1413_v23 }
 0x1db   :  { %v713_v59 = vsel %vm711_vm9, %v3241_v39, %v712_v30  ;;  %v2089_v63 = vsel %vm2087_vm12, %v3241_v39, %v712_v30  ;;  %v1450_v51 = vadd.s32 1, %v3031_v11  ;;  %v780_v61 = vadd.s32 536870912, %v779_v28 }
 0x1dc   :  { %v717_v43 = vsel %vm710_vm7, %v713_v59, %v716_v20  ;;  %v2093_v45 = vsel %vm2086_vm11, %v2089_v63, %v2092_v35  ;;  %v1412_v24 = vor.u32 %v1411_v47, %v1410_v36  ;;  %v1415_v6 = vshll.u32 %v1414_v21, 23 }
 0x1dd   :  { %v718_v13 = vsel %vm708_vm8, nan, %v717_v43  ;;  %v2094_v10 = vsel %vm708_vm8, nan, %v2093_v45  ;;  %vm1451_vm0 = vcmp.gt.s32.totalorder %v1450_v51, 0  ;;  %v4357_v12 = vshrl.u32 %v780_v61, 30 }
 0x1de   :  { %v1553_v19 = vmul.f32 %v4112_v27, %v718_v13  ;;  %v2931_v56 = vmul.f32 %v4112_v27, %v2094_v10  ;;  %v1416_v9 = vor.u32 4788187, %v1415_v6  ;;  %v1452_v53 = vsel %vm1451_vm0, %v1450_v51, 0 }
 0x1df   :  { %v1419_v34 = vcvt.s32.f32 %v1412_v24  ;;  %v1454_v41 = vand.u32 31, %v1452_v53  ;;  %v1426_v1 = vsel %vm4361_vm2, 0, %v1424_v29  ;;  %v782_v4 = vshll.u32 %v4357_v12, 30 }
 0x1e0   :  { %1566 = vst [vmem:[#allocation2 + $0x40] sm:$0xff] %v1553_v19  ;;  %2944 = vst [vmem:[#allocation2 + $0x48] sm:$0xff] %v2931_v56  ;;  %v1417_v26 = vand.u32 2147483647, %v1416_v9  ;;  %v1447_v46 = vand.u32 8388607, %v1440_v17  ;;  %v775_v45 = vadd.s32 %v4321_v5, %v4328_v18  ;;  %vm1429_vm13 = vweird.f32 %v3624_v37 }
 0x1e1   :  { %v1455_v2 = vsub.s32 32, %v1454_v41  ;;  %v1457_v7 = vshll.u32 %v3286_v54, %v1454_v41  ;;  %v1460_v31 = vshll.u32 %v3287_v58, %v1454_v41  ;;  %v825_v57 = vand.u32 2139095040, %v3964_v55 }
 0x1e2   :  { %v1420_v32 = vmul.f32 %v1419_v34, %v1417_v26  ;;  %v4373_v14 = vsub.s32 %v779_v28, %v782_v4  ;;  %v1463_v52 = vshll.u32 %v3288_v60, %v1454_v41  ;;  %v1466_v42 = vshll.u32 %v3289_v62, %v1454_v41 }
 0x1e3   :  { %v1458_v39 = vshrl.u32 %v3287_v58, %v1455_v2  ;;  %v1461_v48 = vshrl.u32 %v3288_v60, %v1455_v2  ;;  %v1464_v33 = vshrl.u32 %v3289_v62, %v1455_v2  ;;  %v1467_v49 = vshrl.u32 %v3290_v0, %v1455_v2 }
 0x1e4   :  { %v1421_v3 = vxor.u32 2147483648, %v1420_v32  ;;  %v2812_v23 = vadd.s32 3, %v1426_v1  ;;  %v785_v25 = vsub.s32 0, %v4373_v14  ;;  %v1448_v30 = vor.u32 8388608, %v1447_v46 }
 0x1e5   :  { %v1453_v36 = vshrl.u32 %v1452_v53, 5  ;;  %v1469_v11 = vshll.u32 %v3290_v0, %v1454_v41  ;;  %v826_v20 = vshrl.u32 %v825_v57, 23  ;;  %v1459_v47 = vor.u32 %v1458_v39, %v1457_v7 }
 0x1e6   :  { %v1422_v40 = vsel %vm1339_vm1, %v1421_v3, %v1420_v32  ;;  %v3004_v35 = vmin.u32 %v785_v25, %v4373_v14  ;;  %v1462_v21 = vor.u32 %v1461_v48, %v1460_v31  ;;  %v4389_v59 = vand.u32 3, %v1426_v1 }
 0x1e7   :  { %v1425_v15 = vsel %vm4361_vm2, %v3624_v37, %v1422_v40  ;;  %v1465_v63 = vor.u32 %v1464_v33, %v1463_v52  ;;  %v1468_v38 = vor.u32 %v1467_v49, %v1466_v42  ;;  %v1470_v51 = vshrl.u32 %v3291_v8, %v1455_v2 }
 0x1e8   :  { %3244 = vcosq.f32 %v1425_v15  ;;  %v4392_v43 = vand.u32 3, %v2812_v23  ;;  %v787_v24 = vclz %v3004_v35  ;;  %v4396_v6 = vshll.u32 %v1448_v30, 8 }
 0x1e9   :  { %3246 = vsinq.f32 %v1425_v15  ;;  %v1456_v13 = vshrl.u32 %v3286_v54, %v1455_v2  ;;  %v1471_v10 = vor.u32 %v1470_v51, %v1469_v11  ;;  %vm1472_vm3 = vcmp.lt.s32.totalorder %v1453_v36, 1 }
 0x1ea   :  { %v3007_v28 = vadd.s32 4294967169, %v826_v20  ;;  %vm721_vm4 = vcmp.lt.s32.totalorder %v3785_v16, 0  ;;  %v3005_v19 = vadd.s32 4294967294, %v787_v24  ;;  %vm1474_vm5 = vcmp.lt.s32.totalorder %v1453_v36, 3 }
 0x1eb   :  { %vm1475_vm6 = vcmp.lt.s32.totalorder %v1453_v36, 4  ;;  %v1480_v56 = vsel %vm1472_vm3, %v1459_v47, %v1462_v21  ;;  %v1484_v53 = vsel %vm1472_vm3, %v1462_v21, %v1465_v63  ;;  %vm1435_vm7 = vcmp.eq.s32.totalorder %v4389_v59, 2 }
 0x1ec   :  { %v1477_v9 = vsel %vm1475_vm6, %v1465_v63, 2102212464  ;;  %v1481_v61 = vsel %vm1475_vm6, %v1468_v38, 920167782  ;;  %v1485_v5 = vsel %vm1475_vm6, %v1471_v10, 1326507024  ;;  %v1476_v4 = vsel %vm1472_vm3, %v1456_v13, %v1459_v47 }
 0x1ed   :  { %vm3006_vm8 = vcmp.lt.s32.totalorder %v3005_v19, 0  ;;  %vm1473_vm9 = vcmp.lt.s32.totalorder %v1453_v36, 2  ;;  %v1482_v18 = vsel %vm1474_vm5, %v1465_v63, %v1481_v61  ;;  %v1486_v26 = vsel %vm1474_vm5, %v1468_v38, %v1485_v5 }
 0x1ee   :  { %vm1432_vm10 = vcmp.eq.s32.totalorder %v4389_v59, 0  ;;  %v790_v34 = vsel %vm3006_vm8, 0, %v3005_v19  ;;  %v805_v29 = vsub.s32 4, %v4357_v12  ;;  %v1483_v41 = vsel %vm1473_vm9, %v1480_v56, %v1482_v18 }
 0x1ef   :  { %v1487_v44 = vsel %vm1473_vm9, %v1484_v53, %v1486_v26  ;;  %vm1431_vm11 = vcmp.lt.s32.totalorder %v4389_v59, 2  ;;  %vm4412_vm12 = vcmp.le.f32.partialorder %v719_v22, 0.7853982  ;;  %v791_v2 = vsub.s32 32, %v790_v34 }
 0x1f0   :  { %v795_v1 = vsub.s32 4294967266, %v790_v34  ;;  %v1478_v46 = vsel %vm1474_vm5, %v1462_v21, %v1477_v9  ;;  %v4420_v3 = vmul.u32.u64.low %v4396_v6, %v1487_v44  ;;  %v4421_v7 = vmul.u32.u64.high %v4396_v6, %v1487_v44, %v4420_v3 }
 0x1f1   :  { %v4424_v31 = vmul.u32.u64.low %v4396_v6, %v1483_v41  ;;  %v4425_v57 = vmul.u32.u64.high %v4396_v6, %v1483_v41, %v4424_v31  ;;  %v792_v22 = vshll.u32 %v4373_v14, %v790_v34  ;;  %v793_v39 = vshrl.u32 %v775_v45, %v791_v2 }
 0x1f2   :  { %v796_v48 = vadd.s32 127, %v795_v1  ;;  %v832_v52 = vadd.s32 1, %v3007_v28  ;;  %vm2814_vm14 = vcmp.lt.s32.totalorder %v4392_v43, 2  ;;  %vm2815_vm15 = vcmp.eq.s32.totalorder %v4392_v43, 0 }
 0x1f3   :  { %vm2818_vm0 = vcmp.eq.s32.totalorder %v4392_v43, 2  ;;  %v1479_v40 = vsel %vm1473_vm9, %v1476_v4, %v1478_v46  ;;  %v794_v42 = vor.u32 %v793_v39, %v792_v22  ;;  %v822_v15 = vand.u32 2147483647, %v3964_v55 }
 0x1f4   :  { %v797_v49 = vshll.u32 %v796_v48, 23  ;;  %vm833_vm1 = vcmp.gt.s32.totalorder %v832_v52, 0  ;;  %v806_v14 = vsel %vm721_vm4, %v805_v29, %v4357_v12  ;;  %vm1497_vm2 = vc.u32 %v4421_v7, %v4424_v31 }
 0x1f5   :  { %v3245_v33 = vpop.eup %3244  ;;  %v1498_v30 = vadd.s32 1, %v4425_v57  ;;  %v1495_v20 = vmul.u32 %v4396_v6, %v1479_v40  ;;  %v834_v35 = vsel %vm833_vm1, %v832_v52, 0  ;;  %v801_v63 = vcvt.s32.f32 %v794_v42 }
 0x1f6   :  { %v3247_v23 = vpop.eup %3246  ;;  %v1436_v25 = vxor.u32 2147483648, %v3245_v33  ;;  %v798_v36 = vor.u32 4788187, %v797_v49  ;;  %v808_v10 = vsel %vm4412_vm12, 0, %v806_v14  ;;  %v836_v28 = vand.u32 31, %v834_v35 }
 0x1f7   :  { %v1433_v11 = vxor.u32 2147483648, %v3247_v23  ;;  %v1499_v38 = vsel %vm1497_vm2, %v1498_v30, %v4425_v57  ;;  %v2188_v26 = vadd.s32 3, %v808_v10  ;;  %v829_v34 = vand.u32 8388607, %v822_v15 }
 0x1f8   :  { %v1437_v47 = vsel %vm1435_vm7, %v1436_v25, %v3247_v23  ;;  %v2820_v21 = vsel %vm2818_vm0, %v1436_v25, %v3247_v23  ;;  %v799_v45 = vand.u32 2147483647, %v798_v36  ;;  %v1500_v24 = vadd.s32 %v1499_v38, %v1495_v20 }
 0x1f9   :  { %v1434_v12 = vsel %vm1432_vm10, %v3245_v33, %v1433_v11  ;;  %v2817_v51 = vsel %vm2815_vm15, %v3245_v33, %v1433_v11  ;;  %v837_v5 = vsub.s32 32, %v836_v28  ;;  %v839_v4 = vshll.u32 %v3286_v54, %v836_v28 }
 0x1fa   :  { %v1438_v6 = vsel %vm1431_vm11, %v1434_v12, %v1437_v47  ;;  %v2821_v13 = vsel %vm2814_vm14, %v2817_v51, %v2820_v21  ;;  %v802_v9 = vmul.f32 %v801_v63, %v799_v45  ;;  %v1501_v61 = vadd.s32 536870912, %v1500_v24 }
 0x1fb   :  { %v1439_v19 = vsel %vm1429_vm13, nan, %v1438_v6  ;;  %v2822_v56 = vsel %vm1429_vm13, nan, %v2821_v13  ;;  %v840_v29 = vshrl.u32 %v3287_v58, %v837_v5  ;;  %v843_v37 = vshrl.u32 %v3288_v60, %v837_v5 }
 0x1fc   :  { %v1560_v53 = vmul.f32 %v4112_v27, %v1439_v19  ;;  %v2938_v59 = vmul.f32 %v4112_v27, %v2822_v56  ;;  %v803_v18 = vxor.u32 2147483648, %v802_v9  ;;  %v4462_v43 = vshrl.u32 %v1501_v61, 30 }
 0x1fd   :  { %v835_v27 = vshrl.u32 %v834_v35, 5  ;;  %v846_v2 = vshrl.u32 %v3289_v62, %v837_v5  ;;  %v842_v46 = vshll.u32 %v3287_v58, %v836_v28  ;;  %v845_v3 = vshll.u32 %v3288_v60, %v836_v28 }
 0x1fe   :  { %1573 = vst [vmem:[#allocation2 + $0xb0] sm:$0xff] %v1560_v53  ;;  %2951 = vst [vmem:[#allocation2 + $0xb8] sm:$0xff] %v2938_v59  ;;  %v804_v41 = vsel %vm721_vm4, %v803_v18, %v802_v9  ;;  %v1503_v44 = vshll.u32 %v4462_v43, 30  ;;  %v848_v22 = vshll.u32 %v3289_v62, %v836_v28  ;;  %v849_v39 = vshrl.u32 %v3290_v0, %v837_v5 }
 0x1ff   :  { %v807_v1 = vsel %vm4412_vm12, %v3785_v16, %v804_v41  ;;  %v841_v48 = vor.u32 %v840_v29, %v839_v4  ;;  %v844_v52 = vor.u32 %v843_v37, %v842_v46  ;;  %v852_v40 = vshrl.u32 %v3291_v8, %v837_v5 }
 0x200   :  { %3248 = vcosq.f32 %v807_v1  ;;  %v4478_v57 = vsub.s32 %v1500_v24, %v1503_v44  ;;  %v847_v33 = vor.u32 %v846_v2, %v845_v3  ;;  %v850_v42 = vor.u32 %v849_v39, %v848_v22 }
 0x201   :  { %3250 = vsinq.f32 %v807_v1  ;;  %v851_v58 = vshll.u32 %v3290_v0, %v836_v28  ;;  %v830_v49 = vor.u32 8388608, %v829_v34  ;;  %v812_v25 = vand.u32 3, %v808_v10 }
 0x202   :  { %v1506_v32 = vsub.s32 0, %v4478_v57  ;;  %v2189_v14 = vand.u32 3, %v2188_v26  ;;  %vm854_vm3 = vcmp.lt.s32.totalorder %v835_v27, 1  ;;  %vm857_vm4 = vcmp.lt.s32.totalorder %v835_v27, 4 }
 0x203   :  { %v853_v23 = vor.u32 %v852_v40, %v851_v58  ;;  %v859_v30 = vsel %vm857_vm4, %v847_v33, 2102212464  ;;  %v862_v11 = vsel %vm854_vm3, %v841_v48, %v844_v52  ;;  %v863_v36 = vsel %vm857_vm4, %v850_v42, 920167782 }
 0x204   :  { %v3032_v60 = vmin.u32 %v1506_v32, %v4478_v57  ;;  %v838_v8 = vshrl.u32 %v3286_v54, %v837_v5  ;;  %vm856_vm5 = vcmp.lt.s32.totalorder %v835_v27, 3  ;;  %v866_v20 = vsel %vm854_vm3, %v844_v52, %v847_v33 }
 0x205   :  { %v870_v35 = vshll.u32 %v830_v49, 8  ;;  %vm855_vm6 = vcmp.lt.s32.totalorder %v835_v27, 2  ;;  %v864_v0 = vsel %vm856_vm5, %v847_v33, %v863_v36  ;;  %v867_v21 = vsel %vm857_vm4, %v853_v23, 1326507024 }
 0x206   :  { %v1508_v62 = vclz %v3032_v60  ;;  %v858_v63 = vsel %vm854_vm3, %v838_v8, %v841_v48  ;;  %v860_v38 = vsel %vm856_vm5, %v844_v52, %v859_v30  ;;  %v865_v12 = vsel %vm855_vm6, %v862_v11, %v864_v0  ;;  %v4511_v48 = vld [vmem:[%s4544_s2] ss:$0 sm:$0xff]  ;;  %s3292_s2 = smov [#allocation2]  }
 0x207   :  { %v868_v51 = vsel %vm856_vm5, %v850_v42, %v867_v21  ;;  %v4489_v24 = vmul.u32.u64.low %v870_v35, %v865_v12  ;;  %v4490_v6 = vmul.u32.u64.high %v870_v35, %v865_v12, %v4489_v24  ;;  %vm813_vm8 = vcmp.lt.s32.totalorder %v812_v25, 2  ;;  %s2958_s17 = sshll.u32 %s3292_s2, 4  ;;  %s2959_s17 = int_to_ptr.vmem [resolvable:$true] %s2958_s17 }
 0x208   :  { %v3033_v47 = vadd.s32 4294967294, %v1508_v62  ;;  %v869_v45 = vsel %vm855_vm6, %v866_v20, %v868_v51  ;;  %vm814_vm9 = vcmp.eq.s32.totalorder %v812_v25, 0  ;;  %v1496_v28 = vadd.s32 %v4424_v31, %v4421_v7  ;;  %s3262_s1 = scalar_lea.vmem %s2959_s17, 3328  ;;  %p3267_p1 = scmp.lt.s32.totalorder %s2959_s17, %s2959_s17 }
 0x209   :  { %v4493_v13 = vmul.u32.u64.low %v870_v35, %v869_v45  ;;  %v4494_v10 = vmul.u32.u64.high %v870_v35, %v869_v45, %v4493_v13  ;;  %vm817_vm10 = vcmp.eq.s32.totalorder %v812_v25, 2  ;;  %vm2190_vm11 = vcmp.lt.s32.totalorder %v2189_v14, 2  ;;  %p3263_p0 = scmp.ne.s32.totalorder %s2959_s17, %s3262_s1  ;;  %p3268_p2 = scmp.lt.s32.totalorder %s3262_s1, %s3262_s1 }
 0x20a   :  { %vm3034_vm7 = vcmp.lt.s32.totalorder %v3033_v47, 0  ;;  %v861_v53 = vsel %vm855_vm6, %v858_v63, %v860_v38  ;;  %v880_v34 = vadd.s32 1, %v4490_v6  ;;  %vm2191_vm12 = vcmp.eq.s32.totalorder %v2189_v14, 0 }
 0x20b   :  { %v1511_v54 = vsel %vm3034_vm7, 0, %v3033_v47  ;;  %vm2194_vm13 = vcmp.eq.s32.totalorder %v2189_v14, 2  ;;  %vm879_vm14 = vc.u32 %v4494_v10, %v4489_v24  ;;  %v877_v2 = vmul.u32 %v870_v35, %v861_v53  ;;  %p3269_p3 = por %p3268_p2, %p3267_p1 }
 0x20c   :  { %v1512_v19 = vsub.s32 32, %v1511_v54  ;;  %v1516_v56 = vsub.s32 4294967266, %v1511_v54  ;;  %v1513_v61 = vshll.u32 %v4478_v57, %v1511_v54  ;;  %v881_v1 = vsel %vm879_vm14, %v880_v34, %v4490_v6 }
 0x20d   :  { %v3249_v9 = vpop.eup %3248  ;;  %vm811_vm15 = vweird.f32 %v3785_v16  ;;  %v882_v39 = vadd.s32 %v881_v1, %v877_v2  ;;  %vm1442_vm0 = vcmp.lt.s32.totalorder %v3855_v50, 0  ;;  %v1526_v60 = vsub.s32 4, %v4462_v43  ;;  %p3270_p4 = pnand %p3269_p3, %p3263_p0 }
 0x20e   :  { %v3251_v59 = vpop.eup %3250  ;;  %v818_v5 = vxor.u32 2147483648, %v3249_v9  ;;  %v1514_v18 = vshrl.u32 %v1496_v28, %v1512_v19  ;;  %v1517_v26 = vadd.s32 127, %v1516_v56  ;;  %vm1441_vm1 = vcmp.le.f32.partialorder %v1440_v17, 0.7853982 }
 0x20f   :  { %v815_v29 = vxor.u32 2147483648, %v3251_v59  ;;  %v883_v16 = vadd.s32 536870912, %v882_v39  ;;  %v1527_v30 = vsel %vm1442_vm0, %v1526_v60, %v4462_v43  ;;  %v878_v17 = vadd.s32 %v4489_v24, %v4494_v10 }
 0x210   :  { %v819_v7 = vsel %vm817_vm10, %v818_v5, %v3251_v59  ;;  %v2196_v31 = vsel %vm2194_vm13, %v818_v5, %v3251_v59  ;;  %v1515_v37 = vor.u32 %v1514_v18, %v1513_v61  ;;  %v1518_v41 = vshll.u32 %v1517_v26, 23 }
 0x211   :  { %v816_v44 = vsel %vm814_vm9, %v3249_v9, %v815_v29  ;;  %v2193_v27 = vsel %vm2191_vm12, %v3249_v9, %v815_v29  ;;  %v4515_v58 = vshrl.u32 %v883_v16, 30  ;;  %v1529_v8 = vsel %vm1441_vm1, 0, %v1527_v30 }
 0x212   :  { %v820_v4 = vsel %vm813_vm8, %v816_v44, %v819_v7  ;;  %v2197_v46 = vsel %vm2190_vm11, %v2193_v27, %v2196_v31  ;;  %v1519_v3 = vor.u32 4788187, %v1518_v41  ;;  %v1522_v33 = vcvt.s32.f32 %v1515_v37 }
 0x213   :  { %v821_v57 = vsel %vm811_vm15, nan, %v820_v4  ;;  %v2198_v22 = vsel %vm811_vm15, nan, %v2197_v46  ;;  %v885_v23 = vshll.u32 %v4515_v58, 30  ;;  %v2916_v35 = vadd.s32 3, %v1529_v8 }
 0x214   :  { %v1554_v52 = vmul.f32 %v4511_v48, %v821_v57  ;;  %v2932_v40 = vmul.f32 %v4511_v48, %v2198_v22  ;;  %v1520_v32 = vand.u32 2147483647, %v1519_v3  ;;  %v1533_v0 = vand.u32 3, %v1529_v8 }
 0x215   :  { %v886_v62 = vsub.s32 %v882_v39, %v885_v23  ;;  %v2917_v63 = vand.u32 3, %v2916_v35  ;;  %vm1532_vm9 = vweird.f32 %v3855_v50  ;;  %vm824_vm10 = vcmp.lt.s32.totalorder %v3964_v55, 0 }
 0x216   :  { %1567 = vst [vmem:[#allocation2 + $0x50] sm:$0xff] %v1554_v52  ;;  %2945 = vst [vmem:[#allocation2 + $0x58] sm:$0xff] %v2932_v40  ;;  %v1523_v42 = vmul.f32 %v1522_v33, %v1520_v32  ;;  %vm1534_vm3 = vcmp.lt.s32.totalorder %v1533_v0, 2  ;;  %vm1538_vm4 = vcmp.eq.s32.totalorder %v1533_v0, 2  ;;  %vm1535_vm6 = vcmp.eq.s32.totalorder %v1533_v0, 0 }
 0x217   :  { %v888_v11 = vsub.s32 0, %v886_v62  ;;  %vm2922_vm5 = vcmp.eq.s32.totalorder %v2917_v63, 2  ;;  %vm2919_vm7 = vcmp.eq.s32.totalorder %v2917_v63, 0  ;;  %vm2918_vm8 = vcmp.lt.s32.totalorder %v2917_v63, 2 }
 0x218   :  { %v1524_v49 = vxor.u32 2147483648, %v1523_v42  ;;  %v908_v44 = vsub.s32 4, %v4515_v58  ;;  %vm823_vm11 = vcmp.le.f32.partialorder %v822_v15, 0.7853982 }
 0x219   :  { %v3008_v36 = vmin.u32 %v888_v11, %v886_v62 }
 0x21a   :  { %v1525_v25 = vsel %vm1442_vm0, %v1524_v49, %v1523_v42  ;;  %v909_v2 = vsel %vm824_vm10, %v908_v44, %v4515_v58 }
 0x21b   :  { %v1528_v14 = vsel %vm1441_vm1, %v3855_v50, %v1525_v25  ;;  %v890_v20 = vclz %v3008_v36  ;;  %v911_v1 = vsel %vm823_vm11, 0, %v909_v2 }
 0x21c   :  { %3252 = vcosq.f32 %v1528_v14  ;;  %v2292_v4 = vadd.s32 3, %v911_v1  ;;  %v915_v46 = vand.u32 3, %v911_v1 }
 0x21d   :  { %3254 = vsinq.f32 %v1528_v14  ;;  %v3009_v47 = vadd.s32 4294967294, %v890_v20 }
 0x21e   :  { %v2293_v3 = vand.u32 3, %v2292_v4  ;;  %vm920_vm12 = vcmp.eq.s32.totalorder %v915_v46, 2  ;;  %vm917_vm14 = vcmp.eq.s32.totalorder %v915_v46, 0  ;;  %vm916_vm0 = vcmp.lt.s32.totalorder %v915_v46, 2 }
 0x21f   :  { %vm3010_vm2 = vcmp.lt.s32.totalorder %v3009_v47, 0 }
 0x220   :  { %v893_v21 = vsel %vm3010_vm2, 0, %v3009_v47  ;;  %vm2298_vm13 = vcmp.eq.s32.totalorder %v2293_v3, 2  ;;  %vm2295_vm15 = vcmp.eq.s32.totalorder %v2293_v3, 0  ;;  %vm2294_vm1 = vcmp.lt.s32.totalorder %v2293_v3, 2 }
 0x221   :  { %v894_v38 = vsub.s32 32, %v893_v21  ;;  %v898_v12 = vsub.s32 4294967266, %v893_v21  ;;  %v895_v45 = vshll.u32 %v886_v62, %v893_v21  ;;  %vm914_vm2 = vweird.f32 %v3964_v55 }
 0x223   :  { %v896_v6 = vshrl.u32 %v878_v17, %v894_v38  ;;  %v899_v43 = vadd.s32 127, %v898_v12 }
 0x225   :  { %v897_v19 = vor.u32 %v896_v6, %v895_v45  ;;  %v900_v56 = vshll.u32 %v899_v43, 23 }
 0x227   :  { %v901_v10 = vor.u32 4788187, %v900_v56  ;;  %v904_v29 = vcvt.s32.f32 %v897_v19 }
 0x229   :  { %v3253_v51 = vpop.eup %3252  ;;  %v902_v34 = vand.u32 2147483647, %v901_v10 }
 0x22a   :  { %v3255_v54 = vpop.eup %3254  ;;  %v1539_v13 = vxor.u32 2147483648, %v3253_v51 }
 0x22b   :  { %v1536_v28 = vxor.u32 2147483648, %v3255_v54  ;;  %v905_v37 = vmul.f32 %v904_v29, %v902_v34 }
 0x22c   :  { %v1540_v9 = vsel %vm1538_vm4, %v1539_v13, %v3255_v54  ;;  %v2924_v61 = vsel %vm2922_vm5, %v1539_v13, %v3255_v54 }
 0x22d   :  { %v1537_v53 = vsel %vm1535_vm6, %v3253_v51, %v1536_v28  ;;  %v2921_v24 = vsel %vm2919_vm7, %v3253_v51, %v1536_v28  ;;  %v906_v41 = vxor.u32 2147483648, %v905_v37 }
 0x22e   :  { %v1541_v59 = vsel %vm1534_vm3, %v1537_v53, %v1540_v9  ;;  %v2925_v5 = vsel %vm2918_vm8, %v2921_v24, %v2924_v61 }
 0x22f   :  { %v1542_v18 = vsel %vm1532_vm9, nan, %v1541_v59  ;;  %v2926_v26 = vsel %vm1532_vm9, nan, %v2925_v5  ;;  %v907_v50 = vsel %vm824_vm10, %v906_v41, %v905_v37 }
 0x230   :  { %v1561_v7 = vmul.f32 %v4511_v48, %v1542_v18  ;;  %v2939_v31 = vmul.f32 %v4511_v48, %v2926_v26  ;;  %v910_v27 = vsel %vm823_vm11, %v3964_v55, %v907_v50 }
 0x231   :  { %3256 = vcosq.f32 %v910_v27 }
 0x232   :  { %1574 = vst [vmem:[#allocation2 + $0xc0] sm:$0xff] %v1561_v7  ;;  %2952 = vst [vmem:[#allocation2 + $0xc8] sm:$0xff] %v2939_v31  ;;  %3258 = vsinq.f32 %v910_v27 }
 0x23e   :  { %v3257_v57 = vpop.eup %3256 }
 0x23f   :  { %v3259_v22 = vpop.eup %3258  ;;  %v921_v39 = vxor.u32 2147483648, %v3257_v57 }
 0x240   :  { %v918_v52 = vxor.u32 2147483648, %v3259_v22 }
 0x241   :  { %v922_v40 = vsel %vm920_vm12, %v921_v39, %v3259_v22  ;;  %v2300_v15 = vsel %vm2298_vm13, %v921_v39, %v3259_v22 }
 0x242   :  { %v919_v32 = vsel %vm917_vm14, %v3257_v57, %v918_v52  ;;  %v2297_v33 = vsel %vm2295_vm15, %v3257_v57, %v918_v52 }
 0x243   :  { %v923_v16 = vsel %vm916_vm0, %v919_v32, %v922_v40  ;;  %v2301_v42 = vsel %vm2294_vm1, %v2297_v33, %v2300_v15 }
 0x244   :  { %v924_v58 = vsel %vm914_vm2, nan, %v923_v16  ;;  %v2302_v49 = vsel %vm914_vm2, nan, %v2301_v42 }
 0x245   :  { %v1555_v60 = vmul.f32 %v4511_v48, %v924_v58  ;;  %v2933_v23 = vmul.f32 %v4511_v48, %v2302_v49 }
 0x247   :  { %1568 = vst [vmem:[#allocation2 + $0x60] sm:$0xff] %v1555_v60  ;;  %2946 = vst [vmem:[#allocation2 + $0x68] sm:$0xff] %v2933_v23 }
 0x248   :  { %3273 = shalt.err (!%p3270_p4)
}
 0x249   :  { %s3293_s18 = smov 256   ;;  %s3294_s19 = smov 16  }
 0x24a   :  { %2964 = dma.vmem_to_hbm [thread:$0]  %s2959_s17, 3328, %s4545_s3, [#allocation3], %s3293_s18, %s3293_s18, %s3294_s19  }
 0x24b   :  { %3282 = dma.done.wait [#allocation3], 3328  }
 0x24c   :  { %3283 = vsyncadd [#allocation3], 4294963968 }
 0x24d   :  { %2968 = vsyncpa [#allocation3], 1 }

</bundles_post_ra>
